<compile_context>
chip_gen: v7x
topology: tpu7x:2x2x1
jax: 0.10.0
libtpu: 0.0.40
codegen_flags: <defaults>
</compile_context>

<pallas_src>
import functools

import jax
import jax.numpy as jnp
from jax.experimental import pallas as pl
from jax.experimental.pallas import tpu as pltpu


def _round_up(a, m):
    return ((a + m - 1) // m) * m


def _vector_classifier_kernel(x_ref, wt_ref, b_ref, lw_ref, pred_ref, wnll_ref,
                              *, n_valid, tile_n):
    """One batch tile: Linear -> softmax / log-softmax -> per-tile weighted causal BCE sum.

    x_ref   : [TILE_N, H]  f32   activation tile (streamed; tail rows of last tile = garbage)
    wt_ref  : [H, L]       bf16  Linear weight, transposed (grid-invariant)
    b_ref   : [1, L]       f32   Linear bias (grid-invariant)
    lw_ref  : [TILE_N, 2]  f32   col 0 = label, col 1 = gathered causal weight (tail = garbage)
    pred_ref: [TILE_N, L]  f32   softmax probabilities (tail rows masked on writeback by Pallas)
    wnll_ref: [1, 1, 1]    f32   per-tile sum of  w_sel * BCE  (summed over tiles in the wrapper)
    """
    # ---- Linear layer on the MXU: cast to bf16 in-kernel (f32 accumulation) ----
    x = x_ref[...].astype(jnp.bfloat16)
    logits = jnp.dot(x, wt_ref[...], preferred_element_type=jnp.float32) + b_ref[...]  # [TILE_N, L]

    # ---- stable softmax + log-softmax (single exp, EUP reciprocal, no log(prob)) ----
    m = jnp.max(logits, axis=1, keepdims=True)
    shifted = logits - m
    e = jnp.exp(shifted)
    denom = jnp.sum(e, axis=1, keepdims=True)
    pred_ref[...] = e * pl.reciprocal(denom, approx=True)        # softmax probabilities
    logp = shifted - jnp.log(denom)                              # log-softmax

    # ---- weighted causal BCE, reduced to one scalar per tile ----
    labels = lw_ref[:, 0:1]                                      # [TILE_N, 1]
    wsel = lw_ref[:, 1:2]                                        # [TILE_N, 1]
    nll = -(labels * logp[:, 1:2] + (1.0 - labels) * logp[:, 0:1])

    # Mask the ragged tail of the last tile: x/lw are NOT padded, so those rows are garbage
    # (possibly NaN) and must be zeroed explicitly before the reduction.
    row = pl.program_id(0) * tile_n + jax.lax.broadcasted_iota(jnp.int32, (tile_n, 1), 0)
    contrib = jnp.where(row < n_valid, wsel * nll, 0.0)

    tile_sum = jnp.sum(contrib, keepdims=True)                   # (1, 1)
    wnll_ref[...] = tile_sum.reshape(1, 1, 1)


def vector_classifier_forward(x, weight, bias, w, lambdas, x_indexes, labels,
                              *, target_x_tile_bytes=2 << 20, vmem_block_budget=24 << 20):
    """Train-mode forward of Vector_Classifier. Returns the same dict as the PyTorch module."""
    N, H = x.shape
    L, H2 = weight.shape
    assert H == H2
    assert L >= 2, "forward uses prediction[:, 0] / prediction[:, 1]"

    x = x.astype(jnp.float32)

    # Glue (data-dependent gather, no clean in-kernel equivalent): torch.gather(w*w, 0, x_indexes),
    # fused with the labels into a single narrow [N, 2] side stream.
    w_selected = (w * w)[x_indexes].astype(jnp.float32)          # [N]
    labels_f = labels.astype(jnp.float32)                        # [N]
    lw = jnp.stack([labels_f, w_selected], axis=1)               # [N, 2]

    wt = weight.T.astype(jnp.bfloat16)                           # [H, L]
    b2 = bias.reshape(1, L).astype(jnp.float32)                  # [1, L]

    # ---- lane-padded, double-buffered VMEM accounting (a (t,2)/(t,L) f32 block occupies
    #      t * 128 * 4 bytes of VMEM, not t * 2 * 4) ----
    def _block_vmem_bytes(tile_n):
        lane = lambda d: _round_up(d, 128)
        sub = lambda d: _round_up(d, 8)
        x_blk = sub(tile_n) * lane(H) * 4            # f32 activation tile
        wt_blk = _round_up(H, 16) * lane(L) * 2      # bf16 W^T (grid-invariant)
        b_blk = 8 * lane(L) * 4                      # f32 bias
        lw_blk = sub(tile_n) * lane(2) * 4           # [label, w_sel] tile
        pred_blk = sub(tile_n) * lane(L) * 4         # softmax output tile
        wnll_blk = 8 * 128 * 4                       # per-tile scalar
        return x_blk + wt_blk + b_blk + lw_blk + pred_blk + wnll_blk

    # TILE_N from a byte budget: ~target_x_tile_bytes of useful x traffic per tile, multiple
    # of 128, shrunk until the double-buffered lane-padded footprint fits the VMEM budget
    # (keeps vmem_limit <= ~32 MiB, safe for v7x's 64 MiB/TC; v5e/v6e have 128 MiB headroom).
    TILE_N = max(128, _round_up(target_x_tile_bytes // (4 * H), 128))
    TILE_N = min(TILE_N, _round_up(N, 128))
    while TILE_N > 128 and 2 * _block_vmem_bytes(TILE_N) > vmem_block_budget:
        TILE_N -= 128
    num_tiles = -(-N // TILE_N)

    vmem_need = 2 * _block_vmem_bytes(TILE_N)
    vmem_limit = int(min(max(vmem_need + vmem_need // 4 + (2 << 20), 8 << 20), 64 << 20))

    kernel = functools.partial(_vector_classifier_kernel, n_valid=N, tile_n=TILE_N)

    pred, wnll = pl.pallas_call(
        kernel,
        grid=(num_tiles,),
        in_specs=[
            pl.BlockSpec((TILE_N, H), lambda i: (i, 0)),     # x tile (f32, streamed, tail masked)
            pl.BlockSpec((H, L), lambda i: (0, 0)),          # W^T   (grid-invariant)
            pl.BlockSpec((1, L), lambda i: (0, 0)),          # bias  (grid-invariant)
            pl.BlockSpec((TILE_N, 2), lambda i: (i, 0)),     # [label, w_sel]
        ],
        out_specs=(
            pl.BlockSpec((TILE_N, L), lambda i: (i, 0)),     # softmax probabilities
            pl.BlockSpec((1, 1, 1), lambda i: (i, 0, 0)),    # per-tile weighted-NLL partial sum
        ),
        out_shape=(
            jax.ShapeDtypeStruct((N, L), jnp.float32),
            jax.ShapeDtypeStruct((num_tiles, 1, 1), jnp.float32),
        ),
        compiler_params=pltpu.CompilerParams(
            dimension_semantics=("parallel",),
            vmem_limit_bytes=vmem_limit,
        ),
    )(x, wt, b2, lw)

    part1 = jnp.sum(wnll)                                    # one scalar per tile

    # L1/L2 regularizers only touch the parameters: grid-invariant, computed once here.
    l1 = jnp.sum(jnp.abs(weight)) + jnp.sum(jnp.abs(bias))
    l2 = jnp.sum(weight ** 2) + jnp.sum(bias ** 2)

    loss = part1 + lambdas[3] * l2 + lambdas[4] * l1
    return {
        'loss': loss,
        'loss_detail': jnp.stack([part1, l2, l1]),
        'prediction': jnp.argmax(pred, axis=1),              # glue: trivial post-processing
        'pred_orign': pred,
    }


def _reference_forward(x, weight, bias, w, lambdas, x_indexes, labels, *, bf16_matmul):
    """Pure-JAX reference mirroring the PyTorch forward (train mode)."""
    if bf16_matmul:
        logits = jnp.dot(x.astype(jnp.bfloat16), weight.T.astype(jnp.bfloat16),
                         preferred_element_type=jnp.float32) + bias
    else:
        logits = x @ weight.T + bias
    pred = jax.nn.softmax(logits, axis=1)
    logp = jax.nn.log_softmax(logits, axis=1)
    l1 = jnp.sum(jnp.abs(weight)) + jnp.sum(jnp.abs(bias))
    l2 = jnp.sum(weight ** 2) + jnp.sum(bias ** 2)
    w_sel = (w * w)[x_indexes]
    part1 = -(labels * logp[:, 1] + (1 - labels) * logp[:, 0])
    part1 = jnp.sum(w_sel * part1)
    loss = part1 + lambdas[3] * l2 + lambdas[4] * l1
    return loss, jnp.stack([part1, l2, l1]), jnp.argmax(pred, axis=1), pred


if __name__ == "__main__":
    hidden_size = 32
    num_labels = 2       # forward uses prediction[:, 0] / prediction[:, 1] => binary head
    batch = 200          # not a multiple of the 128-row tile -> exercises the tail mask
    dataset_size = 64    # length of the causal weight vector `w`

    key = jax.random.PRNGKey(0)
    k_x, k_w, k_b, k_cw, k_idx, k_lab = jax.random.split(key, 6)

    x = jax.random.normal(k_x, (batch, hidden_size), dtype=jnp.float32)
    weight = 0.1 * jax.random.normal(k_w, (num_labels, hidden_size), dtype=jnp.float32)
    bias = 0.1 * jax.random.normal(k_b, (num_labels,), dtype=jnp.float32)
    w_causal = jax.random.uniform(k_cw, (dataset_size,), dtype=jnp.float32, minval=0.5, maxval=1.5)
    x_indexes = jax.random.randint(k_idx, (batch,), 0, dataset_size)
    labels = jax.random.randint(k_lab, (batch,), 0, 2).astype(jnp.float32)
    lambdas = jnp.array([0.0, 0.0, 0.0, 0.01, 0.001], dtype=jnp.float32)

    out = vector_classifier_forward(x, weight, bias, w_causal, lambdas, x_indexes, labels)
    jax.block_until_ready(out['loss'])

    # Reference with the same bf16-matmul precision choice.
    ref_loss, ref_detail, ref_argmax, ref_pred = _reference_forward(
        x, weight, bias, w_causal, lambdas, x_indexes, labels, bf16_matmul=True)

    assert out['pred_orign'].shape == (batch, num_labels)
    # pred tolerance covers the approximate (EUP) reciprocal in the softmax normalization.
    assert jnp.allclose(out['pred_orign'], ref_pred, rtol=2e-3, atol=2e-3)
    assert jnp.allclose(out['loss_detail'], ref_detail, rtol=1e-4, atol=1e-3)
    assert jnp.allclose(out['loss'], ref_loss, rtol=1e-4, atol=1e-3)
    assert jnp.array_equal(out['prediction'], ref_argmax)

    # Sanity check vs full-f32 semantics (loose tolerance for the deliberate bf16 matmul).
    f32_loss, _, _, _ = _reference_forward(
        x, weight, bias, w_causal, lambdas, x_indexes, labels, bf16_matmul=False)
    assert jnp.allclose(out['loss'], f32_loss, rtol=5e-2, atol=1e-1)

    print("KERNEL_OK")
</pallas_src>

<mosaic_0001>
module attributes {stable_mosaic.version = 11 : i64} {
  func.func @_vector_classifier_kernel(%arg0: i32, %arg1: memref<256x32xf32, #tpu.memory_space<vmem>>, %arg2: memref<32x2xbf16, #tpu.memory_space<vmem>>, %arg3: memref<1x2xf32, #tpu.memory_space<vmem>>, %arg4: memref<256x2xf32, #tpu.memory_space<vmem>>, %arg5: memref<256x2xf32, #tpu.memory_space<vmem>>, %arg6: memref<1x1x1xf32, #tpu.memory_space<vmem>>) attributes {dimension_semantics = [#tpu.dimension_semantics<parallel>], iteration_bounds = array<i64: 1>, scalar_prefetch = 0 : i64, scratch_operands = 0 : i64, tpu.core_type = #tpu.core_type<tc>, window_params = [{transform_indices = @transform_0, window_bounds = array<i64: 256, 32>}, {pipeline_mode = #tpu.pipeline_mode<synchronous>, transform_indices = @transform_1, window_bounds = array<i64: 32, 2>}, {pipeline_mode = #tpu.pipeline_mode<synchronous>, transform_indices = @transform_2, window_bounds = array<i64: 1, 2>}, {transform_indices = @transform_3, window_bounds = array<i64: 256, 2>}, {transform_indices = @transform_4, window_bounds = array<i64: 256, 2>}, {transform_indices = @transform_5, window_bounds = array<i64: 1, 1, 1>}]} {
    %c0 = arith.constant 0 : index
    %c0_0 = arith.constant 0 : index
    %0 = vector.load %arg1[%c0, %c0_0] : memref<256x32xf32, #tpu.memory_space<vmem>>, vector<256x32xf32>
    %1 = arith.truncf %0 : vector<256x32xf32> to vector<256x32xbf16>
    %c0_1 = arith.constant 0 : index
    %c0_2 = arith.constant 0 : index
    %2 = vector.load %arg2[%c0_1, %c0_2] : memref<32x2xbf16, #tpu.memory_space<vmem>>, vector<32x2xbf16>
    %cst = arith.constant dense<0.000000e+00> : vector<256x2xf32>
    %3 = tpu.matmul %1, %2, %cst {dimension_numbers = #tpu.dot_dimension_numbers<[1], [0], [0], [1], [0, 0, 1, 1], [], []>} : vector<256x32xbf16>, vector<32x2xbf16>, vector<256x2xf32> -> vector<256x2xf32>
    %c0_3 = arith.constant 0 : index
    %c0_4 = arith.constant 0 : index
    %4 = vector.load %arg3[%c0_3, %c0_4] : memref<1x2xf32, #tpu.memory_space<vmem>>, vector<1x2xf32>
    %5 = vector.broadcast %4 : vector<1x2xf32> to vector<256x2xf32>
    %6 = arith.addf %3, %5 : vector<256x2xf32>
    %cst_5 = arith.constant dense<0xFF800000> : vector<256xf32>
    %7 = vector.multi_reduction <maximumf>, %6, %cst_5 [1] : vector<256x2xf32> to vector<256xf32>
    %8 = vector.shape_cast %7 : vector<256xf32> to vector<256x1xf32>
    %9 = vector.broadcast %8 : vector<256x1xf32> to vector<256x2xf32>
    %10 = arith.subf %6, %9 : vector<256x2xf32>
    %11 = math.exp %10 : vector<256x2xf32>
    %cst_6 = arith.constant dense<0.000000e+00> : vector<256xf32>
    %12 = vector.multi_reduction <add>, %11, %cst_6 [1] : vector<256x2xf32> to vector<256xf32>
    %13 = vector.shape_cast %12 : vector<256xf32> to vector<256x1xf32>
    %14 = tpu.reciprocal %13 {approx = true} : vector<256x1xf32> -> vector<256x1xf32>
    %15 = vector.broadcast %14 : vector<256x1xf32> to vector<256x2xf32>
    %16 = arith.mulf %11, %15 : vector<256x2xf32>
    %c0_7 = arith.constant 0 : index
    %c0_8 = arith.constant 0 : index
    %17 = vector.load %arg5[%c0_7, %c0_8] : memref<256x2xf32, #tpu.memory_space<vmem>>, vector<256x2xf32>
    tpu.vector_store %arg5[%c0_7, %c0_8], %16 {strides = array<i32>} : memref<256x2xf32, #tpu.memory_space<vmem>>, vector<256x2xf32>,
    %18 = math.log %13 : vector<256x1xf32>
    %19 = vector.broadcast %18 : vector<256x1xf32> to vector<256x2xf32>
    %20 = arith.subf %10, %19 : vector<256x2xf32>
    %c0_9 = arith.constant 0 : index
    %c0_10 = arith.constant 0 : index
    %21 = vector.load %arg4[%c0_9, %c0_10] : memref<256x2xf32, #tpu.memory_space<vmem>>, vector<256x1xf32>
    %c0_11 = arith.constant 0 : index
    %c1 = arith.constant 1 : index
    %22 = vector.load %arg4[%c0_11, %c1] : memref<256x2xf32, #tpu.memory_space<vmem>>, vector<256x1xf32>
    %23 = vector.extract_strided_slice %20 {offsets = [0, 1], sizes = [256, 1], strides = [1, 1]} : vector<256x2xf32> to vector<256x1xf32>
    %24 = arith.mulf %21, %23 : vector<256x1xf32>
    %cst_12 = arith.constant 1.000000e+00 : f32
    %25 = vector.broadcast %cst_12 : f32 to vector<256x1xf32>
    %26 = arith.subf %25, %21 : vector<256x1xf32>
    %27 = vector.extract_strided_slice %20 {offsets = [0, 0], sizes = [256, 1], strides = [1, 1]} : vector<256x2xf32> to vector<256x1xf32>
    %28 = arith.mulf %26, %27 : vector<256x1xf32>
    %29 = arith.addf %24, %28 : vector<256x1xf32>
    %cst_13 = arith.constant 0.000000e+00 : f32
    %30 = vector.broadcast %cst_13 : f32 to vector<256x1xf32>
    %31 = arith.subf %30, %29 : vector<256x1xf32>
    %c256_i32 = arith.constant 256 : i32
    %32 = arith.muli %arg0, %c256_i32 : i32
    %33 = tpu.iota {dimensions = array<i32: 0>} : vector<256x1xi32>
    %34 = vector.broadcast %32 : i32 to vector<256x1xi32>
    %35 = arith.addi %34, %33 : vector<256x1xi32>
    %c200_i32 = arith.constant 200 : i32
    %36 = vector.broadcast %c200_i32 : i32 to vector<256x1xi32>
    %37 = arith.cmpi slt, %35, %36 : vector<256x1xi32>
    %38 = arith.mulf %22, %31 : vector<256x1xf32>
    %cst_14 = arith.constant 0.000000e+00 : f32
    %39 = vector.broadcast %cst_14 : f32 to vector<256x1xf32>
    %40 = arith.select %37, %38, %39 : vector<256x1xi1>, vector<256x1xf32>
    %41 = vector.shape_cast %40 : vector<256x1xf32> to vector<1x256x1xf32>
    %cst_15 = arith.constant dense<0.000000e+00> : vector<1xf32>
    %42 = vector.multi_reduction <add>, %41, %cst_15 [1, 2] : vector<1x256x1xf32> to vector<1xf32>
    %43 = vector.shape_cast %42 : vector<1xf32> to vector<1x1x1xf32>
    %44 = vector.extract %43[0, 0, 0] : f32 from vector<1x1x1xf32>
    %45 = vector.broadcast %44 : f32 to vector<1x1xf32>
    %46 = vector.shape_cast %45 : vector<1x1xf32> to vector<1x1x1xf32>
    %c0_16 = arith.constant 0 : index
    %c0_17 = arith.constant 0 : index
    %c0_18 = arith.constant 0 : index
    %47 = vector.load %arg6[%c0_16, %c0_17, %c0_18] : memref<1x1x1xf32, #tpu.memory_space<vmem>>, vector<1x1x1xf32>
    tpu.vector_store %arg6[%c0_16, %c0_17, %c0_18], %46 {strides = array<i32>} : memref<1x1x1xf32, #tpu.memory_space<vmem>>, vector<1x1x1xf32>,
    return
  }
  func.func @transform_0(%arg0: i32) -> (i32, i32) {
    %c0_i32 = arith.constant 0 : i32
    %c0_i32_0 = arith.constant 0 : i32
    return %arg0, %c0_i32 : i32, i32
  }
  func.func @transform_1(%arg0: i32) -> (i32, i32) {
    %c0_i32 = arith.constant 0 : i32
    %c0_i32_0 = arith.constant 0 : i32
    %c0_i32_1 = arith.constant 0 : i32
    return %c0_i32, %c0_i32_0 : i32, i32
  }
  func.func @transform_2(%arg0: i32) -> (i32, i32) {
    %c0_i32 = arith.constant 0 : i32
    %c0_i32_0 = arith.constant 0 : i32
    %c0_i32_1 = arith.constant 0 : i32
    return %c0_i32, %c0_i32_0 : i32, i32
  }
  func.func @transform_3(%arg0: i32) -> (i32, i32) {
    %c0_i32 = arith.constant 0 : i32
    %c0_i32_0 = arith.constant 0 : i32
    return %arg0, %c0_i32 : i32, i32
  }
  func.func @transform_4(%arg0: i32) -> (i32, i32) {
    %c0_i32 = arith.constant 0 : i32
    %c0_i32_0 = arith.constant 0 : i32
    return %arg0, %c0_i32 : i32, i32
  }
  func.func @transform_5(%arg0: i32) -> (i32, i32, i32) {
    %c0_i32 = arith.constant 0 : i32
    %c0_i32_0 = arith.constant 0 : i32
    %c0_i32_1 = arith.constant 0 : i32
    return %arg0, %c0_i32, %c0_i32_0 : i32, i32, i32
  }
}

</mosaic_0001>

<bundles_post_ra>
// kernel: tpu_custom_call.1
= control target key start
LH: loop header
LB: loop body
LE: loop exit
PB: predicated region body
PF: predicated region fallthrough
CT: control target
= control target key end

     0   :  { %vm92_vm0 = vcmask 261120   ;;  %s3187_s0 = inlined_call_operand.vmem [shape: f32[200,32], index: 0, kind: input, shape index: {}]   ;;  %s3188_s1 = inlined_call_operand.vmem [shape: bf16[32,2], index: 1, kind: input, shape index: {}]   ;;  %s3189_s2 = inlined_call_operand.vmem [shape: f32[1,2], index: 2, kind: input, shape index: {}]   ;;  %s3190_s3 = inlined_call_operand.vmem [shape: f32[200,2], index: 3, kind: input, shape index: {}]   ;;  %s3191_s4 = inlined_call_operand.vmem [shape: f32[200,2], index: 4, kind: output, shape index: {0}]   ;;  %s3192_s5 = inlined_call_operand.hbm [shape: f32[1,1,1], index: 5, kind: output, shape index: {1}]  }
   0x1   :  { %v1846_v0 = vld [vmem:[%s3188_s1] sm:$0xff]   ;;  %v1847_v1 = vld [vmem:[%s3188_s1 + $0x8] sm:$0xff]   ;;  %v23_v5 = vld [vmem:[%s3187_s0 + $0x10] sm:$0xff] }
   0x2   :  { %1785 = vmatprep.subr.bf16.mxu0 %v1846_v0  ;;  %v21_v2 = vld [vmem:[%s3187_s0] sm:$0xff]  ;;  %v22_v3 = vld [vmem:[%s3187_s0 + $0x8] sm:$0xff]  ;;  %1821 = vmatprep.subr.bf16.mxu1 %v1846_v0  ;;  %v24_v6 = vld [vmem:[%s3187_s0 + $0x18] sm:$0xff] }
   0x3   :  { %1786 = vmatpush3.bf16.msra.mxu0 %v1846_v0  ;;  %v53_v4 = vpack.c.bf16 %v22_v3, %v21_v2  ;;  %1823 = vmatpush3.bf16.msra.mxu1 %v1846_v0  ;;  %v25_v7 = vld [vmem:[%s3187_s0 + $0x20] sm:$0xff]  ;;  %v26_v8 = vld [vmem:[%s3187_s0 + $0x28] sm:$0xff]  ;;  %v54_v9 = vpack.c.bf16 %v24_v6, %v23_v5  ;;  %v39_v14 = vld [vmem:[%s3187_s0 + $0x90] sm:$0xff] }
   0x4   :  { %1787 = vmatprep.subr.bf16.mxu0 %v1847_v1  ;;  %1822 = vmatprep.subr.bf16.mxu1 %v1847_v1  ;;  %v55_v10 = vpack.c.bf16 %v26_v8, %v25_v7  ;;  %v37_v11 = vld [vmem:[%s3187_s0 + $0x80] sm:$0xff]  ;;  %v38_v12 = vld [vmem:[%s3187_s0 + $0x88] sm:$0xff]  ;;  %v40_v15 = vld [vmem:[%s3187_s0 + $0x98] sm:$0xff] }
   0x5   :  { %1789 = vmatprep.mubr.msk.bf16.mxu0 %vm92_vm0, %v53_v4  ;;  %v61_v13 = vpack.c.bf16 %v38_v12, %v37_v11  ;;  %v41_v16 = vld [vmem:[%s3187_s0 + $0xa0] sm:$0xff]  ;;  %v62_v17 = vpack.c.bf16 %v40_v15, %v39_v14  ;;  %v42_v18 = vld [vmem:[%s3187_s0 + $0xa8] sm:$0xff]  ;;  %v27_v19 = vld [vmem:[%s3187_s0 + $0x30] sm:$0xff] }
   0x6   :  { %v63_v20 = vpack.c.bf16 %v42_v18, %v41_v16  ;;  %v28_v21 = vld [vmem:[%s3187_s0 + $0x38] sm:$0xff]  ;;  %v29_v22 = vld [vmem:[%s3187_s0 + $0x40] sm:$0xff] }
   0x7   :  { %1788 = vmatpush3.bf16.msra.mxu0 %v1847_v1  ;;  %1824 = vmatpush3.bf16.msra.mxu1 %v1847_v1 }
   0x8   :  { %1805 = vmatprep.mubr.msk.bf16.mxu1 %vm92_vm0, %v61_v13 }
   0xa   :  { %1790 = vmatmul.mubr.msk.bf16.vlgmr.msra.gmra.mrb[0].mxu0 %vm92_vm0, %v54_v9  ;;  %1806 = vmatmul.mubr.msk.bf16.vlgmr.msra.gmra.mrb[0].mxu1 %vm92_vm0, %v62_v17 }
   0xb   :  { %1793 = vmatprep.mubr.msk.bf16.mxu0 %vm92_vm0, %v55_v10 }
   0xc   :  { %11 = vsyncpa [#allocation4], 0  ;;  %v30_v23 = vld [vmem:[%s3187_s0 + $0x48] sm:$0xff]  ;;  %1809 = vmatprep.mubr.msk.bf16.mxu1 %vm92_vm0, %v63_v20  ;;  %v43_v24 = vld [vmem:[%s3187_s0 + $0xb0] sm:$0xff]  ;;  %v56_v28 = vpack.c.bf16 %v28_v21, %v27_v19  ;;  %vm302_vm1 = vcmask 15360   ;;  %s2052_s19 = smov 1  }
   0xd   :  { %v44_v25 = vld [vmem:[%s3187_s0 + $0xb8] sm:$0xff]  ;;  %v45_v26 = vld [vmem:[%s3187_s0 + $0xc0] sm:$0xff]  ;;  %v46_v27 = vld [vmem:[%s3187_s0 + $0xc8] sm:$0xff]  ;;  %v57_v29 = vpack.c.bf16 %v30_v23, %v29_v22  ;;  %vm1522_vm2 = vcmask 7168   ;;  %vm1596_vm3 = vcmask 0  }
   0xe   :  { %v64_v30 = vpack.c.bf16 %v44_v25, %v43_v24  ;;  %v65_v31 = vpack.c.bf16 %v46_v27, %v45_v26  ;;  %v31_v32 = vld [vmem:[%s3187_s0 + $0x50] sm:$0xff]  ;;  %v32_v33 = vld [vmem:[%s3187_s0 + $0x58] sm:$0xff]  ;;  %v33_v34 = vld [vmem:[%s3187_s0 + $0x60] sm:$0xff] }
   0xf   :  { %v34_v35 = vld [vmem:[%s3187_s0 + $0x68] sm:$0xff]  ;;  %v47_v36 = vld [vmem:[%s3187_s0 + $0xd0] sm:$0xff]  ;;  %v48_v37 = vld [vmem:[%s3187_s0 + $0xd8] sm:$0xff]  ;;  %v58_v38 = vpack.c.bf16 %v32_v33, %v31_v32 }
  0x10   :  { %v59_v39 = vpack.c.bf16 %v34_v35, %v33_v34  ;;  %v66_v40 = vpack.c.bf16 %v48_v37, %v47_v36  ;;  %v35_v41 = vld [vmem:[%s3187_s0 + $0x70] sm:$0xff]  ;;  %v36_v42 = vld [vmem:[%s3187_s0 + $0x78] sm:$0xff]  ;;  %v2192_v44 = vld [vmem:[%s3189_s2] ss:$0 sm:$0xff] }
  0x11   :  { %v60_v43 = vpack.c.bf16 %v36_v42, %v35_v41 }
  0x12   :  { %1794 = vmatmul.mubr.msk.bf16.gmra.mrb[4].mxu0 %vm92_vm0, %v56_v28  ;;  %1810 = vmatmul.mubr.msk.bf16.gmra.mrb[4].mxu1 %vm92_vm0, %v64_v30 }
  0x13   :  { %1797 = vmatprep.mubr.msk.bf16.mxu0 %vm92_vm0, %v57_v29  ;;  %1813 = vmatprep.mubr.msk.bf16.mxu1 %vm92_vm0, %v65_v31 }
  0x1a   :  { %1798 = vmatmul.mubr.msk.bf16.gmra.mrb[8].mxu0 %vm92_vm0, %v58_v38  ;;  %1814 = vmatmul.mubr.msk.bf16.gmra.mrb[8].mxu1 %vm92_vm0, %v66_v40 }
  0x1b   :  { %1801 = vmatprep.mubr.msk.bf16.mxu0 %vm92_vm0, %v59_v39 }
  0x22   :  { %1802 = vmatmul.mubr.msk.bf16.gmra.mrb[12].mxu0 %vm92_vm0, %v60_v43 }
  0xdd   :  { %v1791_v45 = vpop.f32.mrb[0].mxu0  ;;  %v2197_v48 = vpop.f32.mrb[0].mxu1 }
  0xde   :  { %v2195_v46 = vadd.f32 %v1791_v45, %v2192_v44  ;;  %v175_v47 = vpop.f32.mrb[1].mxu0  ;;  %v2202_v51 = vpop.f32.mrb[1].mxu1  ;;  %v2297_v42 = vadd.f32 %v2197_v48, %v2192_v44 }
  0xdf   :  { %v2200_v49 = vadd.f32 %v2192_v44, %v175_v47  ;;  %v1792_v50 = vpop.f32.mrb[2].mxu0  ;;  %v2209_v55 = vpop.f32.mrb[2].mxu1  ;;  %v2288_v39 = vadd.f32 %v2192_v44, %v2202_v51 }
  0xe0   :  { %v2205_v52 = vadd.f32 %v1792_v50, %v2192_v44  ;;  %v178_v53 = vpop.f32.mrb[3].mxu0  ;;  %v309_v54 = vsel %vm302_vm1, %v2195_v46, -inf  ;;  %v242_v58 = vpop.f32.mrb[3].mxu1  ;;  %v2305_v47 = vadd.f32 %v2209_v55, %v2192_v44  ;;  %v357_v48 = vsel %vm302_vm1, %v2297_v42, -inf }
  0xe1   :  { %v2212_v56 = vadd.f32 %v2192_v44, %v178_v53  ;;  %310 = vmax.xlane.f32.xlu1 %v309_v54  ;;  %v303_v57 = vsel %vm302_vm1, %v2200_v49, -inf  ;;  %v2293_v41 = vadd.f32 %v2192_v44, %v242_v58  ;;  %v351_v45 = vsel %vm302_vm1, %v2288_v39, -inf }
  0xe2   :  { %304 = vmax.xlane.f32.xlu0 %v303_v57  ;;  %v312_v59 = vsel %vm302_vm1, %v2205_v52, -inf  ;;  %v360_v54 = vsel %vm302_vm1, %v2305_v47, -inf }
  0xe3   :  { %v306_v61 = vsel %vm302_vm1, %v2212_v56, -inf  ;;  %v354_v50 = vsel %vm302_vm1, %v2293_v41, -inf }
  0xe5   :  { %313 = vmax.xlane.f32.xlu1 %v312_v59  ;;  %v1795_v60 = vpop.f32.mrb[4].mxu0  ;;  %v2220_v63 = vpop.f32.mrb[4].mxu1 }
  0xe6   :  { %v191_v62 = vpop.f32.mrb[5].mxu0  ;;  %307 = vmax.xlane.f32.xlu0 %v306_v61  ;;  %v2223_v0 = vadd.f32 %v1795_v60, %v2192_v44  ;;  %v255_v3 = vpop.f32.mrb[5].mxu1  ;;  %v2321_v55 = vadd.f32 %v2220_v63, %v2192_v44 }
  0xe7   :  { %v2226_v1 = vadd.f32 %v2192_v44, %v191_v62  ;;  %v1796_v2 = vpop.f32.mrb[6].mxu0  ;;  %v2228_v5 = vpop.f32.mrb[6].mxu1  ;;  %v2310_v51 = vadd.f32 %v2192_v44, %v255_v3 }
  0xe8   :  { %v194_v4 = vpop.f32.mrb[7].mxu0  ;;  %v258_v8 = vpop.f32.mrb[7].mxu1  ;;  %v2236_v9 = vadd.f32 %v1796_v2, %v2192_v44  ;;  %v321_v11 = vsel %vm302_vm1, %v2223_v0, -inf  ;;  %v2327_v58 = vadd.f32 %v2228_v5, %v2192_v44  ;;  %v369_v61 = vsel %vm302_vm1, %v2321_v55, -inf }
  0xe9   :  { %v2231_v6 = vadd.f32 %v2192_v44, %v194_v4  ;;  %v315_v7 = vsel %vm302_vm1, %v2226_v1, -inf  ;;  %v2315_v53 = vadd.f32 %v2192_v44, %v258_v8  ;;  %v363_v57 = vsel %vm302_vm1, %v2310_v51, -inf }
  0xea   :  { %316 = vmax.xlane.f32.xlu0 %v315_v7  ;;  %v324_v18 = vsel %vm302_vm1, %v2236_v9, -inf  ;;  %v372_v62 = vsel %vm302_vm1, %v2327_v58, -inf }
  0xeb   :  { %v318_v10 = vsel %vm302_vm1, %v2231_v6, -inf  ;;  %v366_v59 = vsel %vm302_vm1, %v2315_v53, -inf }
  0xec   :  { %319 = vmax.xlane.f32.xlu1 %v318_v10 }
  0xed   :  { %v1799_v12 = vpop.f32.mrb[8].mxu0  ;;  %v2242_v14 = vpop.f32.mrb[8].mxu1 }
  0xee   :  { %v207_v13 = vpop.f32.mrb[9].mxu0  ;;  %322 = vmax.xlane.f32.xlu0 %v321_v11  ;;  %3193 = vst [vmem:[#allocation6_spill] sm:$0xff] %v2242_v14  ;;  %v2245_v15 = vadd.f32 %v1799_v12, %v2192_v44  ;;  %v271_v19 = vpop.f32.mrb[9].mxu1 }
  0xef   :  { %v2248_v16 = vadd.f32 %v2192_v44, %v207_v13  ;;  %v1800_v17 = vpop.f32.mrb[10].mxu0  ;;  %v2252_v21 = vpop.f32.mrb[10].mxu1  ;;  %v2332_v60 = vadd.f32 %v2192_v44, %v271_v19 }
  0xf0   :  { %v210_v20 = vpop.f32.mrb[11].mxu0  ;;  %325 = vmax.xlane.f32.xlu1 %v324_v18  ;;  %3194 = vst [vmem:[#allocation7_spill] sm:$0xff] %v2252_v21  ;;  %v2259_v24 = vpop.f32.mrb[11].mxu1  ;;  %v2262_v25 = vadd.f32 %v1800_v17, %v2192_v44  ;;  %v333_v27 = vsel %vm302_vm1, %v2245_v15, -inf }
  0xf1   :  { %v2255_v22 = vadd.f32 %v2192_v44, %v210_v20  ;;  %v327_v23 = vsel %vm302_vm1, %v2248_v16, -inf  ;;  %3195 = vst [vmem:[#allocation8_spill] sm:$0xff] %v2259_v24  ;;  %v375_v63 = vsel %vm302_vm1, %v2332_v60, -inf }
  0xf2   :  { %328 = vmax.xlane.f32.xlu0 %v327_v23  ;;  %v336_v33 = vsel %vm302_vm1, %v2262_v25, -inf }
  0xf3   :  { %v330_v26 = vsel %vm302_vm1, %v2255_v22, -inf }
  0xf4   :  { %331 = vmax.xlane.f32.xlu1 %v330_v26 }
  0xf5   :  { %v1803_v28 = vpop.f32.mrb[12].mxu0 }
  0xf6   :  { %v223_v29 = vpop.f32.mrb[13].mxu0  ;;  %334 = vmax.xlane.f32.xlu0 %v333_v27  ;;  %v2269_v30 = vadd.f32 %v1803_v28, %v2192_v44 }
  0xf7   :  { %v2272_v31 = vadd.f32 %v2192_v44, %v223_v29  ;;  %v1804_v32 = vpop.f32.mrb[14].mxu0 }
  0xf8   :  { %v226_v34 = vpop.f32.mrb[15].mxu0  ;;  %337 = vmax.xlane.f32.xlu1 %v336_v33  ;;  %v2282_v37 = vadd.f32 %v1804_v32, %v2192_v44  ;;  %v345_v40 = vsel %vm302_vm1, %v2269_v30, -inf }
  0xf9   :  { %v2277_v35 = vadd.f32 %v2192_v44, %v226_v34  ;;  %v339_v36 = vsel %vm302_vm1, %v2272_v31, -inf }
  0xfa   :  { %340 = vmax.xlane.f32.xlu0 %v339_v36  ;;  %v348_v43 = vsel %vm302_vm1, %v2282_v37, -inf }
  0xfb   :  { %v342_v38 = vsel %vm302_vm1, %v2277_v35, -inf }
  0xfc   :  { %343 = vmax.xlane.f32.xlu1 %v342_v38 }
  0xfe   :  { %346 = vmax.xlane.f32.xlu0 %v345_v40 }
 0x100   :  { %349 = vmax.xlane.f32.xlu1 %v348_v43 }
 0x102   :  { %352 = vmax.xlane.f32.xlu0 %v351_v45 }
 0x104   :  { %355 = vmax.xlane.f32.xlu1 %v354_v50 }
 0x106   :  { %358 = vmax.xlane.f32.xlu0 %v357_v48 }
 0x108   :  { %361 = vmax.xlane.f32.xlu1 %v360_v54 }
 0x10a   :  { %364 = vmax.xlane.f32.xlu0 %v363_v57 }
 0x10c   :  { %367 = vmax.xlane.f32.xlu1 %v366_v59 }
 0x10e   :  { %370 = vmax.xlane.f32.xlu0 %v369_v61 }
 0x110   :  { %373 = vmax.xlane.f32.xlu1 %v372_v62 }
 0x112   :  { %376 = vmax.xlane.f32.xlu0 %v375_v63 }
 0x16e   :  { %v311_v2 = vpop.xlane.xlu1 %310 }
 0x16f   :  { %v2341_v3 = vsub.f32 %v2195_v46, %v311_v2  ;;  %v305_v4 = vpop.xlane.xlu0 %304 }
 0x170   :  { %v2344_v44 = vsub.f32 %v2200_v49, %v305_v4 }
 0x171   :  { %v435_v5 = vmul.f32 1.442695, %v2341_v3 }
 0x172   :  { %v431_v7 = vmul.f32 1.442695, %v2344_v44  ;;  %v314_v8 = vpop.xlane.xlu1 %313 }
 0x173   :  { %v2349_v10 = vsub.f32 %v2205_v52, %v314_v8  ;;  %v308_v11 = vpop.xlane.xlu0 %307 }
 0x174   :  { %1848 = vpow2.f32 %v431_v7  ;;  %v2352_v12 = vsub.f32 %v2212_v56, %v308_v11 }
 0x175   :  { %1850 = vpow2.f32 %v435_v5  ;;  %v437_v46 = vmul.f32 1.442695, %v2349_v10 }
 0x176   :  { %v433_v13 = vmul.f32 1.442695, %v2352_v12 }
 0x177   :  { %v317_v49 = vpop.xlane.xlu0 %316 }
 0x178   :  { %1852 = vpow2.f32 %v433_v13  ;;  %v2357_v17 = vsub.f32 %v2226_v1, %v317_v49 }
 0x179   :  { %v320_v18 = vpop.xlane.xlu1 %319  ;;  %1854 = vpow2.f32 %v437_v46 }
 0x17a   :  { %v439_v52 = vmul.f32 1.442695, %v2357_v17  ;;  %v2361_v19 = vsub.f32 %v2231_v6, %v320_v18 }
 0x17b   :  { %v323_v20 = vpop.xlane.xlu0 %322 }
 0x17c   :  { %1856 = vpow2.f32 %v439_v52  ;;  %v441_v56 = vmul.f32 1.442695, %v2361_v19  ;;  %v2365_v23 = vsub.f32 %v2223_v0, %v323_v20 }
 0x17d   :  { %v326_v26 = vpop.xlane.xlu1 %325 }
 0x17e   :  { %v2367_v27 = vpop.eup %1848  ;;  %1858 = vpow2.f32 %v441_v56  ;;  %v443_v1 = vmul.f32 1.442695, %v2365_v23  ;;  %v2371_v28 = vsub.f32 %v2236_v9, %v326_v26 }
 0x17f   :  { %v329_v29 = vpop.xlane.xlu0 %328  ;;  %v495_v6 = vsel %vm302_vm1, %v2367_v27, 0.0  ;;  %v2375_v32 = vpop.eup %1850 }
 0x180   :  { %1860 = vpow2.f32 %v443_v1  ;;  %v445_v33 = vmul.f32 1.442695, %v2371_v28  ;;  %v2379_v0 = vsub.f32 %v2248_v16, %v329_v29  ;;  %496 = vadd.xlane.f32.xlu1 %v495_v6  ;;  %v501_v43 = vsel %vm302_vm1, %v2375_v32, 0.0 }
 0x181   :  { %v332_v34 = vpop.xlane.xlu1 %331 }
 0x182   :  { %v2381_v36 = vpop.eup %1852  ;;  %1862 = vpow2.f32 %v445_v33  ;;  %v447_v9 = vmul.f32 1.442695, %v2379_v0  ;;  %v2385_v38 = vsub.f32 %v2255_v22, %v332_v34 }
 0x183   :  { %v335_v40 = vpop.xlane.xlu0 %334  ;;  %v498_v45 = vsel %vm302_vm1, %v2381_v36, 0.0  ;;  %v2391_v50 = vpop.eup %1854 }
 0x184   :  { %1864 = vpow2.f32 %v447_v9  ;;  %v449_v16 = vmul.f32 1.442695, %v2385_v38  ;;  %v2395_v48 = vsub.f32 %v2245_v15, %v335_v40  ;;  %502 = vadd.xlane.f32.xlu1 %v501_v43  ;;  %499 = vadd.xlane.f32.xlu0 %v498_v45  ;;  %v504_v62 = vsel %vm302_vm1, %v2391_v50, 0.0 }
 0x185   :  { %v338_v54 = vpop.xlane.xlu1 %337 }
 0x186   :  { %v2397_v22 = vpop.eup %1856  ;;  %1866 = vpow2.f32 %v449_v16  ;;  %v451_v57 = vmul.f32 1.442695, %v2395_v48  ;;  %v2401_v59 = vsub.f32 %v2262_v25, %v338_v54 }
 0x187   :  { %v341_v61 = vpop.xlane.xlu0 %340  ;;  %v507_v63 = vsel %vm302_vm1, %v2397_v22, 0.0 }
 0x188   :  { %v2407_v15 = vpop.eup %1858  ;;  %1868 = vpow2.f32 %v451_v57  ;;  %v453_v2 = vmul.f32 1.442695, %v2401_v59  ;;  %v2411_v4 = vsub.f32 %v2272_v31, %v341_v61  ;;  %505 = vadd.xlane.f32.xlu0 %v504_v62  ;;  %508 = vadd.xlane.f32.xlu1 %v507_v63 }
 0x189   :  { %v344_v5 = vpop.xlane.xlu1 %343  ;;  %v510_v46 = vsel %vm302_vm1, %v2407_v15, 0.0 }
 0x18a   :  { %v2413_v25 = vpop.eup %1860  ;;  %1870 = vpow2.f32 %v453_v2  ;;  %v455_v7 = vmul.f32 1.442695, %v2411_v4  ;;  %v2417_v8 = vsub.f32 %v2277_v35, %v344_v5 }
 0x18b   :  { %v347_v11 = vpop.xlane.xlu0 %346  ;;  %v513_v13 = vsel %vm302_vm1, %v2413_v25, 0.0 }
 0x18c   :  { %v2423_v31 = vpop.eup %1862  ;;  %1872 = vpow2.f32 %v455_v7  ;;  %v457_v49 = vmul.f32 1.442695, %v2417_v8  ;;  %v2427_v18 = vsub.f32 %v2269_v30, %v347_v11  ;;  %511 = vadd.xlane.f32.xlu0 %v510_v46  ;;  %514 = vadd.xlane.f32.xlu1 %v513_v13 }
 0x18d   :  { %v350_v52 = vpop.xlane.xlu1 %349  ;;  %v516_v1 = vsel %vm302_vm1, %v2423_v31, 0.0 }
 0x18e   :  { %v2429_v35 = vpop.eup %1864  ;;  %1874 = vpow2.f32 %v457_v49  ;;  %v459_v20 = vmul.f32 1.442695, %v2427_v18  ;;  %v2433_v56 = vsub.f32 %v2282_v37, %v350_v52 }
 0x18f   :  { %v353_v26 = vpop.xlane.xlu0 %352  ;;  %v519_v29 = vsel %vm302_vm1, %v2429_v35, 0.0 }
 0x190   :  { %v2439_v30 = vpop.eup %1866  ;;  %1876 = vpow2.f32 %v459_v20  ;;  %v461_v6 = vmul.f32 1.442695, %v2433_v56  ;;  %v2443_v33 = vsub.f32 %v2288_v39, %v353_v26  ;;  %517 = vadd.xlane.f32.xlu0 %v516_v1  ;;  %520 = vadd.xlane.f32.xlu1 %v519_v29 }
 0x191   :  { %v356_v34 = vpop.xlane.xlu1 %355  ;;  %v522_v45 = vsel %vm302_vm1, %v2439_v30, 0.0 }
 0x192   :  { %v2445_v37 = vpop.eup %1868  ;;  %1878 = vpow2.f32 %v461_v6  ;;  %v463_v9 = vmul.f32 1.442695, %v2443_v33  ;;  %v2449_v40 = vsub.f32 %v2293_v41, %v356_v34 }
 0x193   :  { %v359_v43 = vpop.xlane.xlu0 %358  ;;  %v525_v16 = vsel %vm302_vm1, %v2445_v37, 0.0 }
 0x194   :  { %v2455_v39 = vpop.eup %1870  ;;  %1880 = vpow2.f32 %v463_v9  ;;  %v465_v54 = vmul.f32 1.442695, %v2449_v40  ;;  %v2459_v57 = vsub.f32 %v2297_v42, %v359_v43  ;;  %523 = vadd.xlane.f32.xlu0 %v522_v45  ;;  %526 = vadd.xlane.f32.xlu1 %v525_v16 }
 0x195   :  { %v362_v61 = vpop.xlane.xlu1 %361  ;;  %v528_v5 = vsel %vm302_vm1, %v2455_v39, 0.0 }
 0x196   :  { %v2461_v41 = vpop.eup %1872  ;;  %1882 = vpow2.f32 %v465_v54  ;;  %v467_v62 = vmul.f32 1.442695, %v2459_v57  ;;  %v2465_v63 = vsub.f32 %v2305_v47, %v362_v61 }
 0x197   :  { %v365_v2 = vpop.xlane.xlu0 %364  ;;  %v531_v7 = vsel %vm302_vm1, %v2461_v41, 0.0 }
 0x198   :  { %v2471_v42 = vpop.eup %1874  ;;  %1884 = vpow2.f32 %v467_v62  ;;  %v469_v11 = vmul.f32 1.442695, %v2465_v63  ;;  %v2475_v46 = vsub.f32 %v2310_v51, %v365_v2  ;;  %529 = vadd.xlane.f32.xlu0 %v528_v5  ;;  %532 = vadd.xlane.f32.xlu1 %v531_v7 }
 0x199   :  { %v368_v13 = vpop.xlane.xlu1 %367  ;;  %v534_v26 = vsel %vm302_vm1, %v2471_v42, 0.0 }
 0x19a   :  { %v2477_v47 = vpop.eup %1876  ;;  %1886 = vpow2.f32 %v469_v11  ;;  %v471_v49 = vmul.f32 1.442695, %v2475_v46  ;;  %v2481_v52 = vsub.f32 %v2315_v53, %v368_v13 }
 0x19b   :  { %v371_v20 = vpop.xlane.xlu0 %370  ;;  %v537_v1 = vsel %vm302_vm1, %v2477_v47, 0.0 }
 0x19c   :  { %v2487_v51 = vpop.eup %1878  ;;  %1888 = vpow2.f32 %v471_v49  ;;  %v473_v29 = vmul.f32 1.442695, %v2481_v52  ;;  %v2491_v6 = vsub.f32 %v2321_v55, %v371_v20  ;;  %535 = vadd.xlane.f32.xlu0 %v534_v26  ;;  %538 = vadd.xlane.f32.xlu1 %v537_v1 }
 0x19d   :  { %v374_v34 = vpop.xlane.xlu1 %373  ;;  %v540_v16 = vsel %vm302_vm1, %v2487_v51, 0.0 }
 0x19e   :  { %v2493_v53 = vpop.eup %1880  ;;  %1890 = vpow2.f32 %v473_v29  ;;  %v475_v9 = vmul.f32 1.442695, %v2491_v6  ;;  %v2497_v43 = vsub.f32 %v2327_v58, %v374_v34 }
 0x19f   :  { %v377_v45 = vpop.xlane.xlu0 %376  ;;  %v543_v54 = vsel %vm302_vm1, %v2493_v53, 0.0 }
 0x1a0   :  { %v2503_v55 = vpop.eup %1882  ;;  %1892 = vpow2.f32 %v475_v9  ;;  %v477_v61 = vmul.f32 1.442695, %v2497_v43  ;;  %v2507_v62 = vsub.f32 %v2332_v60, %v377_v45  ;;  %541 = vadd.xlane.f32.xlu0 %v540_v16  ;;  %544 = vadd.xlane.f32.xlu1 %v543_v54 }
 0x1a1   :  { %v546_v5 = vsel %vm302_vm1, %v2503_v55, 0.0 }
 0x1a2   :  { %v2509_v2 = vpop.eup %1884  ;;  %1894 = vpow2.f32 %v477_v61  ;;  %v479_v58 = vmul.f32 1.442695, %v2507_v62 }
 0x1a3   :  { %v549_v7 = vsel %vm302_vm1, %v2509_v2, 0.0 }
 0x1a4   :  { %v2516_v11 = vpop.eup %1886  ;;  %1896 = vpow2.f32 %v479_v58  ;;  %547 = vadd.xlane.f32.xlu0 %v546_v5  ;;  %550 = vadd.xlane.f32.xlu1 %v549_v7  ;;  %v49_v5 = vld [vmem:[%s3187_s0 + $0xe0] sm:$0xff]  ;;  %v50_v7 = vld [vmem:[%s3187_s0 + $0xe8] sm:$0xff] }
 0x1a5   :  { %v552_v13 = vsel %vm302_vm1, %v2516_v11, 0.0 }
 0x1a6   :  { %v2518_v60 = vpop.eup %1888 }
 0x1a7   :  { %v555_v49 = vsel %vm302_vm1, %v2518_v60, 0.0 }
 0x1a8   :  { %v2524_v20 = vpop.eup %1890  ;;  %553 = vadd.xlane.f32.xlu0 %v552_v13  ;;  %556 = vadd.xlane.f32.xlu1 %v555_v49 }
 0x1a9   :  { %v558_v1 = vsel %vm302_vm1, %v2524_v20, 0.0 }
 0x1aa   :  { %v2526_v26 = vpop.eup %1892 }
 0x1ab   :  { %v561_v29 = vsel %vm302_vm1, %v2526_v26, 0.0 }
 0x1ac   :  { %v2532_v34 = vpop.eup %1894  ;;  %559 = vadd.xlane.f32.xlu0 %v558_v1  ;;  %562 = vadd.xlane.f32.xlu1 %v561_v29  ;;  %v67_v1 = vpack.c.bf16 %v50_v7, %v49_v5  ;;  %v51_v29 = vld [vmem:[%s3187_s0 + $0xf0] sm:$0xff] }
 0x1ad   :  { %v564_v45 = vsel %vm302_vm1, %v2532_v34, 0.0 }
 0x1ae   :  { %v2534_v9 = vpop.eup %1896  ;;  %1817 = vmatprep.mubr.msk.bf16.mxu1 %vm92_vm0, %v67_v1 }
 0x1af   :  { %v567_v16 = vsel %vm302_vm1, %v2534_v9, 0.0 }
 0x1b0   :  { %565 = vadd.xlane.f32.xlu0 %v564_v45  ;;  %568 = vadd.xlane.f32.xlu1 %v567_v16  ;;  %v52_v45 = vld [vmem:[%s3187_s0 + $0xf8] sm:$0xff]  ;;  %s2051_s0 = smov 127  }
 0x1b1   :  { %v68_v16 = vpack.c.bf16 %v52_v45, %v51_v29 }
 0x1b3   :  { %1818 = vmatmul.mubr.msk.bf16.gmra.mrb[12].mxu1 %vm92_vm0, %v68_v16 }
 0x20d   :  { %v497_v54 = vpop.xlane.xlu1 %496 }
 0x20e   :  { %1898 = vrcp.f32 %v497_v54 }
 0x20f   :  { %1900 = vlog2.f32 %v497_v54 }
 0x211   :  { %v503_v61 = vpop.xlane.xlu1 %502  ;;  %v500_v58 = vpop.xlane.xlu0 %499 }
 0x212   :  { %1902 = vrcp.f32 %v503_v61 }
 0x213   :  { %1904 = vlog2.f32 %v503_v61 }
 0x214   :  { %1906 = vrcp.f32 %v500_v58 }
 0x215   :  { %1908 = vlog2.f32 %v500_v58  ;;  %v509_v13 = vpop.xlane.xlu1 %508  ;;  %v506_v49 = vpop.xlane.xlu0 %505 }
 0x216   :  { %1910 = vrcp.f32 %v509_v13 }
 0x217   :  { %1912 = vlog2.f32 %v509_v13 }
 0x218   :  { %v1899_v54 = vpop.eup %1898  ;;  %1914 = vrcp.f32 %v506_v49 }
 0x219   :  { %v1901_v61 = vpop.eup %1900  ;;  %v623_v58 = vmul.f32 %v1899_v54, %v2367_v27  ;;  %1916 = vlog2.f32 %v506_v49  ;;  %v515_v5 = vpop.xlane.xlu1 %514 }
 0x21a   :  { %v512_v7 = vpop.xlane.xlu0 %511  ;;  %1918 = vrcp.f32 %v515_v5  ;;  %v688_v24 = vmul.f32 0.6931472, %v1901_v61 }
 0x21b   :  { %655 = vst.msk [vmem:[#allocation2] sm:$0xff] %vm302_vm1, %v623_v58  ;;  %1920 = vlog2.f32 %v515_v5 }
 0x21c   :  { %v1903_v21 = vpop.eup %1902  ;;  %1922 = vrcp.f32 %v512_v7  ;;  %v2557_v13 = vsub.f32 %v2344_v44, %v688_v24 }
 0x21d   :  { %v1905_v1 = vpop.eup %1904  ;;  %v625_v29 = vmul.f32 %v1903_v21, %v2375_v32  ;;  %1924 = vlog2.f32 %v512_v7  ;;  %v521_v45 = vpop.xlane.xlu1 %520 }
 0x21e   :  { %v518_v16 = vpop.xlane.xlu0 %517  ;;  %v1907_v27 = vpop.eup %1906  ;;  %847 = vrot.lane.b32.xlu0 %v2557_v13, %s2051_s0  ;;  %1926 = vrcp.f32 %v521_v45  ;;  %v692_v49 = vmul.f32 0.6931472, %v1905_v1 }
 0x21f   :  { %v1909_v54 = vpop.eup %1908  ;;  %657 = vst.msk [vmem:[#allocation2 + $0x10] sm:$0xff] %vm302_vm1, %v625_v29  ;;  %v624_v61 = vmul.f32 %v1907_v27, %v2381_v36  ;;  %1928 = vlog2.f32 %v521_v45 }
 0x220   :  { %v1911_v24 = vpop.eup %1910  ;;  %1930 = vrcp.f32 %v518_v16  ;;  %v2565_v21 = vsub.f32 %v2341_v3, %v692_v49  ;;  %v690_v44 = vmul.f32 0.6931472, %v1909_v54 }
 0x221   :  { %v1913_v32 = vpop.eup %1912  ;;  %656 = vst.msk [vmem:[#allocation2 + $0x8] sm:$0xff] %vm302_vm1, %v624_v61  ;;  %v627_v58 = vmul.f32 %v1911_v24, %v2397_v22  ;;  %1932 = vlog2.f32 %v518_v16  ;;  %v527_v5 = vpop.xlane.xlu1 %526 }
 0x222   :  { %v524_v7 = vpop.xlane.xlu0 %523  ;;  %v1915_v1 = vpop.eup %1914  ;;  %v1675_v14 = vld [vmem:[#allocation2] sm:$0xff]  ;;  %1934 = vrcp.f32 %v527_v5  ;;  %851 = vrot.lane.b32.xlu1 %v2565_v21, %s2051_s0  ;;  %v696_v36 = vmul.f32 0.6931472, %v1913_v32  ;;  %v2580_v16 = vsub.f32 %v2352_v12, %v690_v44 }
 0x223   :  { %v1917_v29 = vpop.eup %1916  ;;  %1676 = vst [vmem:[%s3191_s4] sm:$0xff] %v1675_v14  ;;  %659 = vst.msk [vmem:[#allocation2 + $0x20] sm:$0xff] %vm302_vm1, %v627_v58  ;;  %v626_v3 = vmul.f32 %v1915_v1, %v2391_v50  ;;  %1936 = vlog2.f32 %v527_v5 }
 0x224   :  { %v1919_v22 = vpop.eup %1918  ;;  %1938 = vrcp.f32 %v524_v7  ;;  %v2577_v45 = vsub.f32 %v2357_v17, %v696_v36  ;;  %v694_v27 = vmul.f32 0.6931472, %v1917_v29 }
 0x225   :  { %v1921_v49 = vpop.eup %1920  ;;  %658 = vst.msk [vmem:[#allocation2 + $0x18] sm:$0xff] %vm302_vm1, %v626_v3  ;;  %v629_v54 = vmul.f32 %v1919_v22, %v2413_v25  ;;  %1940 = vlog2.f32 %v524_v7  ;;  %v533_v14 = vpop.xlane.xlu1 %532 }
 0x226   :  { %v530_v61 = vpop.xlane.xlu0 %529  ;;  %v1923_v24 = vpop.eup %1922  ;;  %v1679_v50 = vld [vmem:[#allocation2 + $0x10] sm:$0xff]  ;;  %855 = vrot.lane.b32.xlu0 %v2577_v45, %s2051_s0  ;;  %1942 = vrcp.f32 %v533_v14  ;;  %849 = vrot.lane.b32.xlu1 %v2580_v16, %s2051_s0  ;;  %v700_v12 = vmul.f32 0.6931472, %v1921_v49  ;;  %v2597_v5 = vsub.f32 %v2349_v10, %v694_v27 }
 0x227   :  { %v1925_v17 = vpop.eup %1924  ;;  %1680 = vst [vmem:[%s3191_s4 + $0x10] sm:$0xff] %v1679_v50  ;;  %661 = vst.msk [vmem:[#allocation2 + $0x30] sm:$0xff] %vm302_vm1, %v629_v54  ;;  %v628_v25 = vmul.f32 %v1923_v24, %v2407_v15  ;;  %1944 = vlog2.f32 %v533_v14 }
 0x228   :  { %v1927_v44 = vpop.eup %1926  ;;  %v1677_v32 = vld [vmem:[#allocation2 + $0x8] sm:$0xff]  ;;  %1946 = vrcp.f32 %v530_v61  ;;  %v2594_v58 = vsub.f32 %v2365_v23, %v700_v12  ;;  %v698_v7 = vmul.f32 0.6931472, %v1925_v17 }
 0x229   :  { %v1929_v1 = vpop.eup %1928  ;;  %1678 = vst [vmem:[%s3191_s4 + $0x8] sm:$0xff] %v1677_v32  ;;  %660 = vst.msk [vmem:[#allocation2 + $0x28] sm:$0xff] %vm302_vm1, %v628_v25  ;;  %v631_v15 = vmul.f32 %v1927_v44, %v2429_v35  ;;  %1948 = vlog2.f32 %v530_v61  ;;  %v539_v36 = vpop.xlane.xlu1 %538 }
 0x22a   :  { %v536_v29 = vpop.xlane.xlu0 %535  ;;  %v1931_v3 = vpop.eup %1930  ;;  %v1683_v22 = vld [vmem:[#allocation2 + $0x20] sm:$0xff]  ;;  %859 = vrot.lane.b32.xlu0 %v2594_v58, %s2051_s0  ;;  %1950 = vrcp.f32 %v539_v36  ;;  %853 = vrot.lane.b32.xlu1 %v2597_v5, %s2051_s0  ;;  %v704_v10 = vmul.f32 0.6931472, %v1929_v1  ;;  %v2617_v14 = vsub.f32 %v2361_v19, %v698_v7 }
 0x22b   :  { %v1933_v23 = vpop.eup %1932  ;;  %1684 = vst [vmem:[%s3191_s4 + $0x20] sm:$0xff] %v1683_v22  ;;  %663 = vst.msk [vmem:[#allocation2 + $0x40] sm:$0xff] %vm302_vm1, %v631_v15  ;;  %v630_v35 = vmul.f32 %v1931_v3, %v2423_v31  ;;  %1952 = vlog2.f32 %v539_v36 }
 0x22c   :  { %v1935_v27 = vpop.eup %1934  ;;  %v1681_v49 = vld [vmem:[#allocation2 + $0x18] sm:$0xff]  ;;  %1954 = vrcp.f32 %v536_v29  ;;  %v2614_v54 = vsub.f32 %v2379_v0, %v704_v10  ;;  %v702_v61 = vmul.f32 0.6931472, %v1933_v23 }
 0x22d   :  { %v1937_v24 = vpop.eup %1936  ;;  %1682 = vst [vmem:[%s3191_s4 + $0x18] sm:$0xff] %v1681_v49  ;;  %662 = vst.msk [vmem:[#allocation2 + $0x38] sm:$0xff] %vm302_vm1, %v630_v35  ;;  %v633_v31 = vmul.f32 %v1935_v27, %v2445_v37  ;;  %1956 = vlog2.f32 %v536_v29  ;;  %v545_v50 = vpop.xlane.xlu1 %544 }
 0x22e   :  { %v542_v12 = vpop.xlane.xlu0 %541  ;;  %v1939_v17 = vpop.eup %1938  ;;  %v1687_v25 = vld [vmem:[#allocation2 + $0x30] sm:$0xff]  ;;  %863 = vrot.lane.b32.xlu0 %v2614_v54, %s2051_s0  ;;  %1958 = vrcp.f32 %v545_v50  ;;  %857 = vrot.lane.b32.xlu1 %v2617_v14, %s2051_s0  ;;  %v708_v19 = vmul.f32 0.6931472, %v1937_v24  ;;  %v2637_v1 = vsub.f32 %v2371_v28, %v702_v61 }
 0x22f   :  { %v1941_v0 = vpop.eup %1940  ;;  %1688 = vst [vmem:[%s3191_s4 + $0x30] sm:$0xff] %v1687_v25  ;;  %665 = vst.msk [vmem:[#allocation2 + $0x50] sm:$0xff] %vm302_vm1, %v633_v31  ;;  %v632_v37 = vmul.f32 %v1939_v17, %v2439_v30  ;;  %1960 = vlog2.f32 %v545_v50 }
 0x230   :  { %v1943_v44 = vpop.eup %1942  ;;  %v1685_v32 = vld [vmem:[#allocation2 + $0x28] sm:$0xff]  ;;  %1962 = vrcp.f32 %v542_v12  ;;  %v2634_v7 = vsub.f32 %v2395_v48, %v708_v19  ;;  %v706_v15 = vmul.f32 0.6931472, %v1941_v0 }
 0x231   :  { %v1945_v36 = vpop.eup %1944  ;;  %1686 = vst [vmem:[%s3191_s4 + $0x28] sm:$0xff] %v1685_v32  ;;  %664 = vst.msk [vmem:[#allocation2 + $0x48] sm:$0xff] %vm302_vm1, %v632_v37  ;;  %v635_v30 = vmul.f32 %v1943_v44, %v2461_v41  ;;  %1964 = vlog2.f32 %v542_v12  ;;  %v551_v29 = vpop.xlane.xlu1 %550 }
 0x232   :  { %v548_v3 = vpop.xlane.xlu0 %547  ;;  %v1947_v22 = vpop.eup %1946  ;;  %v1691_v10 = vld [vmem:[#allocation2 + $0x40] sm:$0xff]  ;;  %867 = vrot.lane.b32.xlu0 %v2634_v7, %s2051_s0  ;;  %1966 = vrcp.f32 %v551_v29  ;;  %861 = vrot.lane.b32.xlu1 %v2637_v1, %s2051_s0  ;;  %v712_v28 = vmul.f32 0.6931472, %v1945_v36  ;;  %v2657_v49 = vsub.f32 %v2385_v38, %v706_v15 }
 0x233   :  { %v1949_v48 = vpop.eup %1948  ;;  %1692 = vst [vmem:[%s3191_s4 + $0x40] sm:$0xff] %v1691_v10  ;;  %667 = vst.msk [vmem:[#allocation2 + $0x60] sm:$0xff] %vm302_vm1, %v635_v30  ;;  %v634_v41 = vmul.f32 %v1947_v22, %v2455_v39  ;;  %1968 = vlog2.f32 %v551_v29 }
 0x234   :  { %v1951_v23 = vpop.eup %1950  ;;  %v1689_v35 = vld [vmem:[#allocation2 + $0x38] sm:$0xff]  ;;  %1970 = vrcp.f32 %v548_v3  ;;  %v2654_v27 = vsub.f32 %v2411_v4, %v712_v28  ;;  %v710_v61 = vmul.f32 0.6931472, %v1949_v48 }
 0x235   :  { %v1953_v24 = vpop.eup %1952  ;;  %1690 = vst [vmem:[%s3191_s4 + $0x38] sm:$0xff] %v1689_v35  ;;  %666 = vst.msk [vmem:[#allocation2 + $0x58] sm:$0xff] %vm302_vm1, %v634_v41  ;;  %v637_v39 = vmul.f32 %v1951_v23, %v2477_v47  ;;  %1972 = vlog2.f32 %v548_v3  ;;  %v557_v31 = vpop.xlane.xlu1 %556 }
 0x236   :  { %v554_v50 = vpop.xlane.xlu0 %553  ;;  %v1955_v12 = vpop.eup %1954  ;;  %v1695_v17 = vld [vmem:[#allocation2 + $0x50] sm:$0xff]  ;;  %871 = vrot.lane.b32.xlu0 %v2654_v27, %s2051_s0  ;;  %1974 = vrcp.f32 %v557_v31  ;;  %865 = vrot.lane.b32.xlu1 %v2657_v49, %s2051_s0  ;;  %v716_v38 = vmul.f32 0.6931472, %v1953_v24  ;;  %v2677_v37 = vsub.f32 %v2401_v59, %v710_v61 }
 0x237   :  { %v1957_v4 = vpop.eup %1956  ;;  %1696 = vst [vmem:[%s3191_s4 + $0x50] sm:$0xff] %v1695_v17  ;;  %669 = vst.msk [vmem:[#allocation2 + $0x70] sm:$0xff] %vm302_vm1, %v637_v39  ;;  %v636_v47 = vmul.f32 %v1955_v12, %v2471_v42  ;;  %1976 = vlog2.f32 %v557_v31 }
 0x238   :  { %v1959_v25 = vpop.eup %1958  ;;  %v1693_v19 = vld [vmem:[#allocation2 + $0x48] sm:$0xff]  ;;  %1978 = vrcp.f32 %v554_v50  ;;  %v2674_v0 = vsub.f32 %v2427_v18, %v716_v38  ;;  %v714_v44 = vmul.f32 0.6931472, %v1957_v4 }
 0x239   :  { %v1961_v32 = vpop.eup %1960  ;;  %1694 = vst [vmem:[%s3191_s4 + $0x48] sm:$0xff] %v1693_v19  ;;  %668 = vst.msk [vmem:[#allocation2 + $0x68] sm:$0xff] %vm302_vm1, %v636_v47  ;;  %v639_v42 = vmul.f32 %v1959_v25, %v2493_v53  ;;  %1980 = vlog2.f32 %v554_v50  ;;  %v563_v15 = vpop.xlane.xlu1 %562 }
 0x23a   :  { %v560_v36 = vpop.xlane.xlu0 %559  ;;  %v1963_v30 = vpop.eup %1962  ;;  %v1699_v29 = vld [vmem:[#allocation2 + $0x60] sm:$0xff]  ;;  %875 = vrot.lane.b32.xlu0 %v2674_v0, %s2051_s0  ;;  %1982 = vrcp.f32 %v563_v15  ;;  %869 = vrot.lane.b32.xlu1 %v2677_v37, %s2051_s0  ;;  %v720_v59 = vmul.f32 0.6931472, %v1961_v32  ;;  %v2697_v28 = vsub.f32 %v2417_v8, %v714_v44 }
 0x23b   :  { %v1965_v18 = vpop.eup %1964  ;;  %1700 = vst [vmem:[%s3191_s4 + $0x60] sm:$0xff] %v1699_v29  ;;  %671 = vst.msk [vmem:[#allocation2 + $0x80] sm:$0xff] %vm302_vm1, %v639_v42  ;;  %v638_v53 = vmul.f32 %v1963_v30, %v2487_v51  ;;  %1984 = vlog2.f32 %v563_v15 }
 0x23c   :  { %v1967_v3 = vpop.eup %1966  ;;  %v1697_v22 = vld [vmem:[#allocation2 + $0x58] sm:$0xff]  ;;  %1986 = vrcp.f32 %v560_v36  ;;  %v2694_v10 = vsub.f32 %v2443_v33, %v720_v59  ;;  %v718_v48 = vmul.f32 0.6931472, %v1965_v18 }
 0x23d   :  { %v1969_v41 = vpop.eup %1968  ;;  %1698 = vst [vmem:[%s3191_s4 + $0x58] sm:$0xff] %v1697_v22  ;;  %670 = vst.msk [vmem:[#allocation2 + $0x78] sm:$0xff] %vm302_vm1, %v638_v53  ;;  %v641_v51 = vmul.f32 %v1967_v3, %v2509_v2  ;;  %1988 = vlog2.f32 %v560_v36  ;;  %v569_v23 = vpop.xlane.xlu1 %568 }
 0x23e   :  { %v566_v35 = vpop.xlane.xlu0 %565  ;;  %v1971_v61 = vpop.eup %1970  ;;  %v1703_v24 = vld [vmem:[#allocation2 + $0x70] sm:$0xff]  ;;  %879 = vrot.lane.b32.xlu0 %v2694_v10, %s2051_s0  ;;  %1990 = vrcp.f32 %v569_v23  ;;  %873 = vrot.lane.b32.xlu1 %v2697_v28, %s2051_s0  ;;  %v724_v8 = vmul.f32 0.6931472, %v1969_v41  ;;  %v2717_v12 = vsub.f32 %v2433_v56, %v718_v48 }
 0x23f   :  { %v1973_v33 = vpop.eup %1972  ;;  %1704 = vst [vmem:[%s3191_s4 + $0x70] sm:$0xff] %v1703_v24  ;;  %673 = vst.msk [vmem:[#allocation2 + $0x90] sm:$0xff] %vm302_vm1, %v641_v51  ;;  %v640_v2 = vmul.f32 %v1971_v61, %v2503_v55  ;;  %1992 = vlog2.f32 %v569_v23 }
 0x240   :  { %v1975_v39 = vpop.eup %1974  ;;  %v1701_v31 = vld [vmem:[#allocation2 + $0x68] sm:$0xff]  ;;  %1994 = vrcp.f32 %v566_v35  ;;  %v2714_v50 = vsub.f32 %v2459_v57, %v724_v8  ;;  %v722_v17 = vmul.f32 0.6931472, %v1973_v33 }
 0x241   :  { %v1977_v38 = vpop.eup %1976  ;;  %1702 = vst [vmem:[%s3191_s4 + $0x68] sm:$0xff] %v1701_v31  ;;  %672 = vst.msk [vmem:[#allocation2 + $0x88] sm:$0xff] %vm302_vm1, %v640_v2  ;;  %v643_v55 = vmul.f32 %v1975_v39, %v2518_v60  ;;  %1996 = vlog2.f32 %v566_v35  ;;  %v2813_v2 = vld [vmem:[%s3190_s3 + $0x10] sm:$0xff] }
 0x242   :  { %v1979_v4 = vpop.eup %1978  ;;  %v1707_v47 = vld [vmem:[#allocation2 + $0x80] sm:$0xff]  ;;  %883 = vrot.lane.b32.xlu0 %v2714_v50, %s2051_s0  ;;  %877 = vrot.lane.b32.xlu1 %v2717_v12, %s2051_s0  ;;  %v728_v56 = vmul.f32 0.6931472, %v1977_v38  ;;  %v2737_v32 = vsub.f32 %v2449_v40, %v722_v17  ;;  %v977_v38 = vsub.f32 1.0, %v2813_v2 }
 0x243   :  { %v1981_v57 = vpop.eup %1980  ;;  %1708 = vst [vmem:[%s3191_s4 + $0x80] sm:$0xff] %v1707_v47  ;;  %675 = vst.msk [vmem:[#allocation2 + $0xa0] sm:$0xff] %vm302_vm1, %v643_v55  ;;  %v642_v25 = vmul.f32 %v1979_v4, %v2516_v11  ;;  %v2821_v55 = vld [vmem:[%s3190_s3 + $0x8] sm:$0xff]  ;;  %v2826_v4 = vld [vmem:[%s3190_s3 + $0x20] sm:$0xff] }
 0x244   :  { %v1983_v60 = vpop.eup %1982  ;;  %v1705_v19 = vld [vmem:[#allocation2 + $0x78] sm:$0xff]  ;;  %v2734_v44 = vsub.f32 %v2475_v46, %v728_v56  ;;  %v726_v42 = vmul.f32 0.6931472, %v1981_v57  ;;  %v976_v57 = vsub.f32 1.0, %v2821_v55 }
 0x245   :  { %v1985_v15 = vpop.eup %1984  ;;  %1706 = vst [vmem:[%s3191_s4 + $0x78] sm:$0xff] %v1705_v19  ;;  %674 = vst.msk [vmem:[#allocation2 + $0x98] sm:$0xff] %vm302_vm1, %v642_v25  ;;  %v645_v36 = vmul.f32 %v1983_v60, %v2526_v26  ;;  %v979_v19 = vsub.f32 1.0, %v2826_v4 }
 0x246   :  { %v1987_v30 = vpop.eup %1986  ;;  %v1711_v11 = vld [vmem:[#allocation2 + $0x90] sm:$0xff]  ;;  %v732_v29 = vmul.f32 0.6931472, %v1985_v15  ;;  %887 = vrot.lane.b32.xlu0 %v2734_v44, %s2051_s0  ;;  %881 = vrot.lane.b32.xlu1 %v2737_v32, %s2051_s0  ;;  %v2757_v3 = vsub.f32 %v2465_v63, %v726_v42  ;;  %v2835_v42 = vld [vmem:[%s3190_s3 + $0x18] sm:$0xff] }
 0x247   :  { %v1989_v40 = vpop.eup %1988  ;;  %1712 = vst [vmem:[%s3191_s4 + $0x90] sm:$0xff] %v1711_v11  ;;  %677 = vst.msk [vmem:[#allocation2 + $0xb0] sm:$0xff] %vm302_vm1, %v645_v36  ;;  %v644_v46 = vmul.f32 %v1987_v30, %v2524_v20  ;;  %v2840_v15 = vld [vmem:[%s3190_s3 + $0x30] sm:$0xff] }
 0x248   :  { %v1991_v59 = vpop.eup %1990  ;;  %v1709_v26 = vld [vmem:[#allocation2 + $0x88] sm:$0xff]  ;;  %v730_v18 = vmul.f32 0.6931472, %v1989_v40  ;;  %v2754_v53 = vsub.f32 %v2491_v6, %v732_v29  ;;  %v978_v29 = vsub.f32 1.0, %v2835_v42  ;;  %v981_v40 = vsub.f32 1.0, %v2840_v15 }
 0x249   :  { %v1993_v22 = vpop.eup %1992  ;;  %1710 = vst [vmem:[%s3191_s4 + $0x88] sm:$0xff] %v1709_v26  ;;  %676 = vst.msk [vmem:[#allocation2 + $0xa8] sm:$0xff] %vm302_vm1, %v644_v46  ;;  %v647_v48 = vmul.f32 %v1991_v59, %v2534_v9  ;;  %v1011_v26 = vmul.f32 %v979_v19, %v2577_v45  ;;  %v2887_v19 = vld [vmem:[%s3190_s3 + $0x48] sm:$0xff] }
 0x24a   :  { %v1995_v41 = vpop.eup %1994  ;;  %v1715_v20 = vld [vmem:[#allocation2 + $0xa0] sm:$0xff]  ;;  %v736_v51 = vmul.f32 0.6931472, %v1993_v22  ;;  %891 = vrot.lane.b32.xlu0 %v2754_v53, %s2051_s0  ;;  %885 = vrot.lane.b32.xlu1 %v2757_v3, %s2051_s0  ;;  %v2777_v61 = vsub.f32 %v2481_v52, %v730_v18  ;;  %v2852_v22 = vld [vmem:[%s3190_s3 + $0x28] sm:$0xff]  ;;  %v1013_v45 = vmul.f32 %v981_v40, %v2594_v58  ;;  %v2874_v58 = vld [vmem:[%s3190_s3 + $0x50] sm:$0xff]  ;;  %v984_v40 = vsub.f32 1.0, %v2887_v19 }
 0x24b   :  { %v1997_v63 = vpop.eup %1996  ;;  %1716 = vst [vmem:[%s3191_s4 + $0xa0] sm:$0xff] %v1715_v20  ;;  %679 = vst.msk [vmem:[#allocation2 + $0xc0] sm:$0xff] %vm302_vm1, %v647_v48  ;;  %v646_v6 = vmul.f32 %v1995_v41, %v2532_v34 }
 0x24c   :  { %v1713_v23 = vld [vmem:[#allocation2 + $0x98] sm:$0xff]  ;;  %v734_v9 = vmul.f32 0.6931472, %v1997_v63  ;;  %v2774_v35 = vsub.f32 %v2507_v62, %v736_v51  ;;  %v1010_v51 = vmul.f32 %v978_v29, %v2597_v5 }
 0x24d   :  { %1714 = vst [vmem:[%s3191_s4 + $0x98] sm:$0xff] %v1713_v23  ;;  %678 = vst.msk [vmem:[#allocation2 + $0xb8] sm:$0xff] %vm302_vm1, %v646_v6  ;;  %v980_v6 = vsub.f32 1.0, %v2852_v22 }
 0x24e   :  { %v1719_v24 = vld [vmem:[#allocation2 + $0xb0] sm:$0xff]  ;;  %895 = vrot.lane.b32.xlu0 %v2774_v35, %s2051_s0  ;;  %889 = vrot.lane.b32.xlu1 %v2777_v61, %s2051_s0  ;;  %v2791_v52 = vsub.f32 %v2497_v43, %v734_v9  ;;  %v2807_v43 = vld [vmem:[%s3190_s3] sm:$0xff] }
 0x24f   :  { %1720 = vst [vmem:[%s3191_s4 + $0xb0] sm:$0xff] %v1719_v24  ;;  %v975_v33 = vsub.f32 1.0, %v2807_v43 }
 0x250   :  { %v1717_v62 = vld [vmem:[#allocation2 + $0xa8] sm:$0xff] }
 0x251   :  { %1718 = vst [vmem:[%s3191_s4 + $0xa8] sm:$0xff] %v1717_v62  ;;  %v1007_v31 = vmul.f32 %v975_v33, %v2557_v13  ;;  %v1009_v13 = vmul.f32 %v977_v38, %v2565_v21  ;;  %v1008_v21 = vmul.f32 %v976_v57, %v2580_v16  ;;  %v2857_v16 = vld [vmem:[%s3190_s3 + $0x40] sm:$0xff] }
 0x252   :  { %v1723_v34 = vld [vmem:[#allocation2 + $0xc0] sm:$0xff]  ;;  %893 = vrot.lane.b32.xlu1 %v2791_v52, %s2051_s0  ;;  %v983_v23 = vsub.f32 1.0, %v2857_v16 }
 0x253   :  { %1724 = vst [vmem:[%s3191_s4 + $0xc0] sm:$0xff] %v1723_v34 }
 0x254   :  { %v1721_v8 = vld [vmem:[#allocation2 + $0xb8] sm:$0xff] }
 0x255   :  { %1722 = vst [vmem:[%s3191_s4 + $0xb8] sm:$0xff] %v1721_v8  ;;  %v2869_v8 = vld [vmem:[%s3190_s3 + $0x38] sm:$0xff] }
 0x290   :  { %v848_v39 = vpop.permute.xlu0 %847 }
 0x291   :  { %v943_v17 = vmul.f32 %v848_v39, %v2807_v43 }
 0x293   :  { %v1039_v47 = vadd.f32 %v1007_v31, %v943_v17  ;;  %v1012_v31 = vmul.f32 %v980_v6, %v2617_v14  ;;  %v1015_v17 = vmul.f32 %v983_v23, %v2614_v54  ;;  %v2892_v54 = vld [vmem:[%s3190_s3 + $0x60] sm:$0xff] }
 0x294   :  { %v852_v56 = vpop.permute.xlu1 %851 }
 0x295   :  { %v1071_v25 = vsub.f32 0.0, %v1039_v47  ;;  %v945_v60 = vmul.f32 %v852_v56, %v2813_v2  ;;  %v982_v47 = vsub.f32 1.0, %v2869_v8  ;;  %v985_v56 = vsub.f32 1.0, %v2874_v58 }
 0x297   :  { %v1041_v36 = vadd.f32 %v1009_v13, %v945_v60  ;;  %1234 = vrot.lane.b32.xlu1 %v1071_v25, %s2052_s19 }
 0x298   :  { %v850_v30 = vpop.permute.xlu1 %849  ;;  %v856_v11 = vpop.permute.xlu0 %855 }
 0x299   :  { %v1073_v46 = vsub.f32 0.0, %v1041_v36  ;;  %v944_v59 = vmul.f32 %v850_v30, %v2821_v55  ;;  %v947_v18 = vmul.f32 %v856_v11, %v2826_v4  ;;  %v1017_v11 = vmul.f32 %v985_v56, %v2634_v7  ;;  %v2910_v7 = vld [vmem:[%s3190_s3 + $0x70] sm:$0xff] }
 0x29b   :  { %v1040_v48 = vadd.f32 %v1008_v21, %v944_v59  ;;  %v1043_v41 = vadd.f32 %v1011_v26, %v947_v18  ;;  %1238 = vrot.lane.b32.xlu1 %v1073_v46, %s2052_s19  ;;  %v1014_v21 = vmul.f32 %v982_v47, %v2637_v1  ;;  %v987_v46 = vsub.f32 1.0, %v2892_v54 }
 0x29c   :  { %v854_v20 = vpop.permute.xlu1 %853  ;;  %v860_v63 = vpop.permute.xlu0 %859 }
 0x29d   :  { %v1072_v9 = vsub.f32 0.0, %v1040_v48  ;;  %v1075_v24 = vsub.f32 0.0, %v1043_v41  ;;  %v946_v62 = vmul.f32 %v854_v20, %v2835_v42  ;;  %v949_v34 = vmul.f32 %v860_v63, %v2840_v15  ;;  %v2905_v41 = vld [vmem:[%s3190_s3 + $0x58] sm:$0xff] }
 0x29e   :  { %v1019_v63 = vmul.f32 %v987_v46, %v2654_v27  ;;  %v986_v23 = vsub.f32 1.0, %v2905_v41  ;;  %v2928_v27 = vld [vmem:[%s3190_s3 + $0x80] sm:$0xff] }
 0x29f   :  { %v1042_v5 = vadd.f32 %v1010_v51, %v946_v62  ;;  %v1045_v33 = vadd.f32 %v1013_v45, %v949_v34  ;;  %1236 = vrot.lane.b32.xlu0 %v1072_v9, %s2052_s19  ;;  %1242 = vrot.lane.b32.xlu1 %v1075_v24, %s2052_s19  ;;  %v1016_v45 = vmul.f32 %v984_v40, %v2657_v49  ;;  %v989_v9 = vsub.f32 1.0, %v2910_v7 }
 0x2a0   :  { %v858_v39 = vpop.permute.xlu1 %857  ;;  %v864_v38 = vpop.permute.xlu0 %863 }
 0x2a1   :  { %v1074_v57 = vsub.f32 0.0, %v1042_v5  ;;  %v1077_v25 = vsub.f32 0.0, %v1045_v33  ;;  %v948_v13 = vmul.f32 %v858_v39, %v2852_v22  ;;  %v951_v60 = vmul.f32 %v864_v38, %v2857_v16  ;;  %v2923_v33 = vld [vmem:[%s3190_s3 + $0x68] sm:$0xff] }
 0x2a2   :  { %v1021_v38 = vmul.f32 %v989_v9, %v2674_v0  ;;  %v988_v56 = vsub.f32 1.0, %v2923_v33  ;;  %v2946_v0 = vld [vmem:[%s3190_s3 + $0x90] sm:$0xff] }
 0x2a3   :  { %v1044_v14 = vadd.f32 %v1012_v31, %v948_v13  ;;  %v1047_v36 = vadd.f32 %v1015_v17, %v951_v60  ;;  %1240 = vrot.lane.b32.xlu0 %v1074_v57, %s2052_s19  ;;  %1246 = vrot.lane.b32.xlu1 %v1077_v25, %s2052_s19  ;;  %v1018_v17 = vmul.f32 %v986_v23, %v2677_v37  ;;  %v991_v57 = vsub.f32 1.0, %v2928_v27 }
 0x2a4   :  { %v862_v30 = vpop.permute.xlu1 %861  ;;  %v868_v29 = vpop.permute.xlu0 %867 }
 0x2a5   :  { %v1076_v59 = vsub.f32 0.0, %v1044_v14  ;;  %v1079_v26 = vsub.f32 0.0, %v1047_v36  ;;  %v950_v18 = vmul.f32 %v862_v30, %v2869_v8  ;;  %v953_v48 = vmul.f32 %v868_v29, %v2874_v58  ;;  %v2941_v36 = vld [vmem:[%s3190_s3 + $0x78] sm:$0xff] }
 0x2a6   :  { %v1023_v29 = vmul.f32 %v991_v57, %v2694_v10  ;;  %v990_v46 = vsub.f32 1.0, %v2941_v36  ;;  %v2964_v10 = vld [vmem:[%s3190_s3 + $0xa0] sm:$0xff] }
 0x2a7   :  { %v1046_v1 = vadd.f32 %v1014_v21, %v950_v18  ;;  %v1049_v20 = vadd.f32 %v1017_v11, %v953_v48  ;;  %1244 = vrot.lane.b32.xlu0 %v1076_v59, %s2052_s19  ;;  %1250 = vrot.lane.b32.xlu1 %v1079_v26, %s2052_s19  ;;  %v1020_v11 = vmul.f32 %v988_v56, %v2697_v28  ;;  %v993_v59 = vsub.f32 1.0, %v2946_v0 }
 0x2a8   :  { %v866_v51 = vpop.permute.xlu1 %865  ;;  %v872_v6 = vpop.permute.xlu0 %871 }
 0x2a9   :  { %v1078_v24 = vsub.f32 0.0, %v1046_v1  ;;  %v1081_v62 = vsub.f32 0.0, %v1049_v20  ;;  %v952_v34 = vmul.f32 %v866_v51, %v2887_v19  ;;  %v955_v5 = vmul.f32 %v872_v6, %v2892_v54  ;;  %v2959_v20 = vld [vmem:[%s3190_s3 + $0x88] sm:$0xff] }
 0x2aa   :  { %v1025_v6 = vmul.f32 %v993_v59, %v2714_v50  ;;  %v992_v9 = vsub.f32 1.0, %v2959_v20  ;;  %v2982_v50 = vld [vmem:[%s3190_s3 + $0xb0] sm:$0xff] }
 0x2ab   :  { %v1048_v49 = vadd.f32 %v1016_v45, %v952_v34  ;;  %v1051_v39 = vadd.f32 %v1019_v63, %v955_v5  ;;  %1248 = vrot.lane.b32.xlu0 %v1078_v24, %s2052_s19  ;;  %1254 = vrot.lane.b32.xlu1 %v1081_v62, %s2052_s19  ;;  %v1022_v63 = vmul.f32 %v990_v46, %v2717_v12  ;;  %v995_v24 = vsub.f32 1.0, %v2964_v10 }
 0x2ac   :  { %v870_v31 = vpop.permute.xlu1 %869  ;;  %v876_v47 = vpop.permute.xlu0 %875 }
 0x2ad   :  { %v1080_v25 = vsub.f32 0.0, %v1048_v49  ;;  %v1083_v13 = vsub.f32 0.0, %v1051_v39  ;;  %v954_v60 = vmul.f32 %v870_v31, %v2905_v41  ;;  %v957_v14 = vmul.f32 %v876_v47, %v2910_v7  ;;  %v2977_v39 = vld [vmem:[%s3190_s3 + $0x98] sm:$0xff] }
 0x2ae   :  { %v1027_v47 = vmul.f32 %v995_v24, %v2734_v44  ;;  %v994_v57 = vsub.f32 1.0, %v2977_v39  ;;  %v3000_v44 = vld [vmem:[%s3190_s3 + $0xc0] sm:$0xff] }
 0x2af   :  { %v1050_v37 = vadd.f32 %v1018_v17, %v954_v60  ;;  %v1053_v30 = vadd.f32 %v1021_v38, %v957_v14  ;;  %1252 = vrot.lane.b32.xlu0 %v1080_v25, %s2052_s19  ;;  %1258 = vrot.lane.b32.xlu1 %v1083_v13, %s2052_s19  ;;  %v1024_v38 = vmul.f32 %v992_v9, %v2737_v32  ;;  %v997_v25 = vsub.f32 1.0, %v2982_v50 }
 0x2b0   :  { %v874_v21 = vpop.permute.xlu1 %873  ;;  %v880_v40 = vpop.permute.xlu0 %879 }
 0x2b1   :  { %v1082_v26 = vsub.f32 0.0, %v1050_v37  ;;  %v1085_v18 = vsub.f32 0.0, %v1053_v30  ;;  %v956_v48 = vmul.f32 %v874_v21, %v2923_v33  ;;  %v959_v1 = vmul.f32 %v880_v40, %v2928_v27  ;;  %v2995_v30 = vld [vmem:[%s3190_s3 + $0xa8] sm:$0xff] }
 0x2b2   :  { %v1029_v40 = vmul.f32 %v997_v25, %v2754_v53  ;;  %v996_v59 = vsub.f32 1.0, %v2995_v30 }
 0x2b3   :  { %v1052_v28 = vadd.f32 %v1020_v11, %v956_v48  ;;  %v1055_v51 = vadd.f32 %v1023_v29, %v959_v1  ;;  %1256 = vrot.lane.b32.xlu0 %v1082_v26, %s2052_s19  ;;  %1262 = vrot.lane.b32.xlu1 %v1085_v18, %s2052_s19  ;;  %v1026_v29 = vmul.f32 %v994_v57, %v2757_v3  ;;  %v999_v26 = vsub.f32 1.0, %v3000_v44  ;;  %v3029_v57 = vpop.f32.mrb[12].mxu1 }
 0x2b4   :  { %v878_v45 = vpop.permute.xlu1 %877  ;;  %v884_v23 = vpop.permute.xlu0 %883 }
 0x2b5   :  { %v1084_v62 = vsub.f32 0.0, %v1052_v28  ;;  %v1087_v34 = vsub.f32 0.0, %v1055_v51  ;;  %v958_v5 = vmul.f32 %v878_v45, %v2941_v36  ;;  %v961_v49 = vmul.f32 %v884_v23, %v2946_v0  ;;  %v3013_v51 = vld [vmem:[%s3190_s3 + $0xb8] sm:$0xff]  ;;  %v3031_v25 = vpop.f32.mrb[13].mxu1 }
 0x2b6   :  { %v998_v9 = vsub.f32 1.0, %v3013_v51 }
 0x2b7   :  { %v1054_v12 = vadd.f32 %v1022_v63, %v958_v5  ;;  %v1057_v31 = vadd.f32 %v1025_v6, %v961_v49  ;;  %1260 = vrot.lane.b32.xlu0 %v1084_v62, %s2052_s19  ;;  %1266 = vrot.lane.b32.xlu1 %v1087_v34, %s2052_s19  ;;  %v1028_v63 = vmul.f32 %v996_v59, %v2777_v61 }
 0x2b8   :  { %v882_v17 = vpop.permute.xlu1 %881  ;;  %v888_v56 = vpop.permute.xlu0 %887  ;;  %v1031_v6 = vmul.f32 %v999_v26, %v2774_v35 }
 0x2b9   :  { %v1086_v13 = vsub.f32 0.0, %v1054_v12  ;;  %v1089_v60 = vsub.f32 0.0, %v1057_v31  ;;  %v960_v14 = vmul.f32 %v882_v17, %v2959_v20  ;;  %v963_v37 = vmul.f32 %v888_v56, %v2964_v10 }
 0x2bb   :  { %v1056_v32 = vadd.f32 %v1024_v38, %v960_v14  ;;  %v1059_v21 = vadd.f32 %v1027_v47, %v963_v37  ;;  %1264 = vrot.lane.b32.xlu0 %v1086_v13, %s2052_s19  ;;  %1270 = vrot.lane.b32.xlu1 %v1089_v60, %s2052_s19  ;;  %v1030_v38 = vmul.f32 %v998_v9, %v2791_v52  ;;  %v3033_v13 = vpop.f32.mrb[14].mxu1 }
 0x2bc   :  { %v886_v11 = vpop.permute.xlu1 %885  ;;  %v892_v46 = vpop.permute.xlu0 %891 }
 0x2bd   :  { %v1088_v18 = vsub.f32 0.0, %v1056_v32  ;;  %v1091_v48 = vsub.f32 0.0, %v1059_v21  ;;  %v962_v1 = vmul.f32 %v886_v11, %v2977_v39  ;;  %v965_v28 = vmul.f32 %v892_v46, %v2982_v50  ;;  %v3035_v60 = vpop.f32.mrb[15].mxu1 }
 0x2bf   :  { %v1058_v45 = vadd.f32 %v1026_v29, %v962_v1  ;;  %v1061_v3 = vadd.f32 %v1029_v40, %v965_v28  ;;  %1268 = vrot.lane.b32.xlu0 %v1088_v18, %s2052_s19  ;;  %1274 = vrot.lane.b32.xlu1 %v1091_v48, %s2052_s19 }
 0x2c0   :  { %v890_v53 = vpop.permute.xlu1 %889  ;;  %v896_v23 = vpop.permute.xlu0 %895 }
 0x2c1   :  { %v1090_v24 = vsub.f32 0.0, %v1058_v45  ;;  %v1093_v62 = vsub.f32 0.0, %v1061_v3  ;;  %v964_v34 = vmul.f32 %v890_v53, %v2995_v30  ;;  %v967_v5 = vmul.f32 %v896_v23, %v3000_v44 }
 0x2c3   :  { %v1060_v49 = vadd.f32 %v1028_v63, %v964_v34  ;;  %v1063_v12 = vadd.f32 %v1031_v6, %v967_v5  ;;  %1272 = vrot.lane.b32.xlu0 %v1090_v24, %s2052_s19  ;;  %1278 = vrot.lane.b32.xlu1 %v1093_v62, %s2052_s19 }
 0x2c4   :  { %v894_v31 = vpop.permute.xlu1 %893 }
 0x2c5   :  { %v1092_v17 = vsub.f32 0.0, %v1060_v49  ;;  %v1095_v61 = vsub.f32 0.0, %v1063_v12  ;;  %v966_v35 = vmul.f32 %v894_v31, %v3013_v51 }
 0x2c7   :  { %v1062_v47 = vadd.f32 %v1030_v38, %v966_v35  ;;  %1276 = vrot.lane.b32.xlu0 %v1092_v17, %s2052_s19  ;;  %1282 = vrot.lane.b32.xlu1 %v1095_v61, %s2052_s19  ;;  %v3198_v38 = vld [vmem:[#allocation8_spill] sm:$0xff] }
 0x2c9   :  { %v1094_v56 = vsub.f32 0.0, %v1062_v47 }
 0x2cb   :  { %1280 = vrot.lane.b32.xlu0 %v1094_v56, %s2052_s19 }
 0x309   :  { %v1235_v14 = vpop.permute.xlu1 %1234 }
 0x30a   :  { %v1330_v11 = vmul.f32 %v1235_v14, %v2807_v43 }
 0x30d   :  { %v1239_v37 = vpop.permute.xlu1 %1238 }
 0x30e   :  { %v1332_v52 = vmul.f32 %v1239_v37, %v2813_v2 }
 0x310   :  { %1430 = vrot.lane.b32.xlu0 %v1332_v52, %s2051_s0 }
 0x311   :  { %v1243_v32 = vpop.permute.xlu1 %1242  ;;  %v1237_v21 = vpop.permute.xlu0 %1236 }
 0x312   :  { %v1331_v29 = vmul.f32 %v1237_v21, %v2821_v55  ;;  %v1334_v43 = vmul.f32 %v1243_v32, %v2826_v4 }
 0x314   :  { %1426 = vrot.lane.b32.xlu0 %v1330_v11, %s2051_s0  ;;  %1428 = vrot.lane.b32.xlu1 %v1331_v29, %s2051_s0 }
 0x315   :  { %v1247_v40 = vpop.permute.xlu1 %1246  ;;  %v1241_v46 = vpop.permute.xlu0 %1240 }
 0x316   :  { %v1336_v59 = vmul.f32 %v1247_v40, %v2840_v15  ;;  %v1333_v26 = vmul.f32 %v1241_v46, %v2835_v42 }
 0x318   :  { %1438 = vrot.lane.b32.xlu0 %v1336_v59, %s2051_s0  ;;  %1432 = vrot.lane.b32.xlu1 %v1333_v26, %s2051_s0 }
 0x319   :  { %v1251_v2 = vpop.permute.xlu1 %1250  ;;  %v1245_v18 = vpop.permute.xlu0 %1244 }
 0x31a   :  { %v1335_v55 = vmul.f32 %v1245_v18, %v2852_v22  ;;  %v1338_v4 = vmul.f32 %v1251_v2, %v2857_v16 }
 0x31c   :  { %1434 = vrot.lane.b32.xlu0 %v1334_v43, %s2051_s0  ;;  %1436 = vrot.lane.b32.xlu1 %v1335_v55, %s2051_s0 }
 0x31d   :  { %v1255_v48 = vpop.permute.xlu1 %1254  ;;  %v1249_v1 = vpop.permute.xlu0 %1248 }
 0x31e   :  { %v1340_v15 = vmul.f32 %v1255_v48, %v2874_v58  ;;  %v1337_v42 = vmul.f32 %v1249_v1, %v2869_v8 }
 0x320   :  { %1446 = vrot.lane.b32.xlu0 %v1340_v15, %s2051_s0  ;;  %1440 = vrot.lane.b32.xlu1 %v1337_v42, %s2051_s0 }
 0x321   :  { %v1259_v28 = vpop.permute.xlu1 %1258  ;;  %v1253_v45 = vpop.permute.xlu0 %1252 }
 0x322   :  { %v1339_v22 = vmul.f32 %v1253_v45, %v2887_v19  ;;  %v1342_v16 = vmul.f32 %v1259_v28, %v2892_v54 }
 0x324   :  { %1442 = vrot.lane.b32.xlu0 %v1338_v4, %s2051_s0  ;;  %1444 = vrot.lane.b32.xlu1 %v1339_v22, %s2051_s0 }
 0x325   :  { %v1263_v3 = vpop.permute.xlu1 %1262  ;;  %v1257_v53 = vpop.permute.xlu0 %1256 }
 0x326   :  { %v1344_v58 = vmul.f32 %v1263_v3, %v2910_v7  ;;  %v1341_v8 = vmul.f32 %v1257_v53, %v2905_v41 }
 0x328   :  { %1454 = vrot.lane.b32.xlu0 %v1344_v58, %s2051_s0  ;;  %1448 = vrot.lane.b32.xlu1 %v1341_v8, %s2051_s0 }
 0x329   :  { %v1267_v63 = vpop.permute.xlu1 %1266  ;;  %v1261_v6 = vpop.permute.xlu0 %1260 }
 0x32a   :  { %v1343_v19 = vmul.f32 %v1261_v6, %v2923_v33  ;;  %v1346_v7 = vmul.f32 %v1267_v63, %v2928_v27 }
 0x32c   :  { %1450 = vrot.lane.b32.xlu0 %v1342_v16, %s2051_s0  ;;  %1452 = vrot.lane.b32.xlu1 %v1343_v19, %s2051_s0 }
 0x32d   :  { %v1271_v23 = vpop.permute.xlu1 %1270  ;;  %v1265_v9 = vpop.permute.xlu0 %1264 }
 0x32e   :  { %v1345_v41 = vmul.f32 %v1265_v9, %v2941_v36  ;;  %v1348_v54 = vmul.f32 %v1271_v23, %v2946_v0 }
 0x330   :  { %1458 = vrot.lane.b32.xlu0 %v1346_v7, %s2051_s0  ;;  %1456 = vrot.lane.b32.xlu1 %v1345_v41, %s2051_s0 }
 0x331   :  { %v1275_v24 = vpop.permute.xlu1 %1274  ;;  %v1269_v62 = vpop.permute.xlu0 %1268 }
 0x332   :  { %v1347_v33 = vmul.f32 %v1269_v62, %v2959_v20  ;;  %v1350_v27 = vmul.f32 %v1275_v24, %v2964_v10 }
 0x334   :  { %1462 = vrot.lane.b32.xlu0 %v1348_v54, %s2051_s0  ;;  %1460 = vrot.lane.b32.xlu1 %v1347_v33, %s2051_s0 }
 0x335   :  { %v1279_v34 = vpop.permute.xlu1 %1278  ;;  %v1273_v5 = vpop.permute.xlu0 %1272 }
 0x336   :  { %v1349_v36 = vmul.f32 %v1273_v5, %v2977_v39  ;;  %v1352_v12 = vmul.f32 %v1279_v34, %v2982_v50  ;;  %v2053_v39 = vmov 0.0   ;;  %v2026_v50 = vld [vmem:[%s3189_s2] ss:$0 sm:$0xff]  ;;  %s2054_s2 = smov [#allocation3]  }
 0x337   :  { %v3103_v47 = vadd.f32 %v2026_v50, %v3198_v38  ;;  %v3106_v56 = vadd.f32 %v2026_v50, %v3031_v25  ;;  %v3109_v14 = vadd.f32 %v2026_v50, %v3035_v60  ;;  %v3120_v25 = vadd.f32 %v2026_v50, %v3029_v57 }
 0x338   :  { %1466 = vrot.lane.b32.xlu0 %v1350_v27, %s2051_s0  ;;  %1464 = vrot.lane.b32.xlu1 %v1349_v36, %s2051_s0  ;;  %v3123_v60 = vadd.f32 %v2026_v50, %v3033_v13 }
 0x339   :  { %v1277_v49 = vpop.permute.xlu0 %1276  ;;  %v1283_v20 = vpop.permute.xlu1 %1282  ;;  %v378_v52 = vsel %vm302_vm1, %v3103_v47, -inf  ;;  %v387_v32 = vsel %vm302_vm1, %v3106_v56, -inf  ;;  %v390_v21 = vsel %vm302_vm1, %v3109_v14, -inf  ;;  %v393_v11 = vsel %vm302_vm1, %v3120_v25, -inf }
 0x33a   :  { %v1351_v0 = vmul.f32 %v1277_v49, %v2995_v30  ;;  %v1354_v17 = vmul.f32 %v1283_v20, %v3000_v44  ;;  %v3196_v30 = vld [vmem:[#allocation6_spill] sm:$0xff]  ;;  %v396_v29 = vsel %vm302_vm1, %v3123_v60, -inf }
 0x33b   :  { %v3095_v44 = vadd.f32 %v2026_v50, %v3196_v30 }
 0x33c   :  { %1470 = vrot.lane.b32.xlu0 %v1352_v12, %s2051_s0  ;;  %1468 = vrot.lane.b32.xlu1 %v1351_v0, %s2051_s0 }
 0x33d   :  { %v1281_v31 = vpop.permute.xlu0 %1280  ;;  %v381_v35 = vsel %vm302_vm1, %v3095_v44, -inf }
 0x33e   :  { %v1353_v10 = vmul.f32 %v1281_v31, %v3013_v51  ;;  %v3197_v51 = vld [vmem:[#allocation7_spill] sm:$0xff] }
 0x33f   :  { %v3098_v61 = vadd.f32 %v2026_v50, %v3197_v51 }
 0x340   :  { %1474 = vrot.lane.b32.xlu0 %v1354_v17, %s2051_s0  ;;  %1472 = vrot.lane.b32.xlu1 %v1353_v10, %s2051_s0 }
 0x341   :  { %v384_v37 = vsel %vm302_vm1, %v3098_v61, -inf }
 0x344   :  { %1837 = vrot.lane.b32.xlu0 %v2053_v39, %s2051_s0  ;;  %1832 = vrot.lane.b32.xlu1 %v2053_v39, %s2051_s0 }
 0x348   :  { %1488 = vrot.lane.b32.xlu0 %v2053_v39, %s2051_s0  ;;  %1842 = vrot.lane.b32.xlu1 %v2053_v39, %s2051_s0  ;;  %s1734_s0 = sshll.u32 %s2054_s2, 4  ;;  %s1735_s0 = int_to_ptr.vmem [resolvable:$true] %s1734_s0 }
 0x349   :  { %s2027_s7 = scalar_lea.vmem %s1735_s0, 16  ;;  %s2031_s8 = scalar_lea.vmem %s1735_s0, 32 }
 0x34a   :  { %p2028_p0 = scmp.ne.s32.totalorder %s1735_s0, %s2027_s7  ;;  %p2032_p1 = scmp.lt.s32.totalorder %s1735_s0, %s1735_s0 }
 0x34b   :  { %p2033_p2 = scmp.lt.s32.totalorder %s2031_s8, %s2027_s7 }
 0x34d   :  { %p2034_p3 = por %p2033_p2, %p2032_p1 }
 0x34f   :  { %p2035_p4 = pnand %p2034_p3, %p2028_p0 }
 0x367   :  { %382 = vmax.xlane.f32.xlu0 %v381_v35 }
 0x36b   :  { %385 = vmax.xlane.f32.xlu0 %v384_v37 }
 0x36c   :  { %379 = vmax.xlane.f32.xlu1 %v378_v52 }
 0x36f   :  { %388 = vmax.xlane.f32.xlu0 %v387_v32 }
 0x370   :  { %391 = vmax.xlane.f32.xlu1 %v390_v21 }
 0x373   :  { %394 = vmax.xlane.f32.xlu0 %v393_v11 }
 0x374   :  { %397 = vmax.xlane.f32.xlu1 %v396_v29 }
 0x382   :  { %v1431_v40 = vpop.permute.xlu0 %1430 }
 0x383   :  { %v1526_v2 = vsel %vm1522_vm2, %v1431_v40, 0.0 }
 0x386   :  { %v1429_v46 = vpop.permute.xlu1 %1428  ;;  %v1427_v59 = vpop.permute.xlu0 %1426 }
 0x387   :  { %v1524_v57 = vsel %vm1522_vm2, %v1429_v46, 0.0  ;;  %v1523_v26 = vsel %vm1522_vm2, %v1427_v59, 0.0 }
 0x388   :  { %v1525_v13 = vadd.f32 %v1524_v57, %v1523_v26 }
 0x38a   :  { %v1433_v18 = vpop.permute.xlu1 %1432  ;;  %v1527_v43 = vadd.f32 %v1526_v2, %v1525_v13  ;;  %v1439_v55 = vpop.permute.xlu0 %1438 }
 0x38b   :  { %v1528_v48 = vsel %vm1522_vm2, %v1433_v18, 0.0  ;;  %v1534_v58 = vsel %vm1522_vm2, %v1439_v55, 0.0 }
 0x38c   :  { %v1529_v1 = vadd.f32 %v1528_v48, %v1527_v43 }
 0x38e   :  { %v1437_v15 = vpop.permute.xlu1 %1436  ;;  %v1435_v42 = vpop.permute.xlu0 %1434 }
 0x38f   :  { %v1530_v28 = vsel %vm1522_vm2, %v1435_v42, 0.0  ;;  %v1532_v4 = vsel %vm1522_vm2, %v1437_v15, 0.0 }
 0x390   :  { %v1531_v45 = vadd.f32 %v1530_v28, %v1529_v1 }
 0x392   :  { %v1533_v22 = vadd.f32 %v1532_v4, %v1531_v45  ;;  %v1441_v3 = vpop.permute.xlu1 %1440  ;;  %v1447_v53 = vpop.permute.xlu0 %1446 }
 0x393   :  { %v1536_v63 = vsel %vm1522_vm2, %v1441_v3, 0.0  ;;  %v1542_v54 = vsel %vm1522_vm2, %v1447_v53, 0.0 }
 0x394   :  { %v1535_v8 = vadd.f32 %v1534_v58, %v1533_v22 }
 0x396   :  { %v1537_v6 = vadd.f32 %v1536_v63, %v1535_v8  ;;  %v1445_v16 = vpop.permute.xlu1 %1444  ;;  %v1443_v19 = vpop.permute.xlu0 %1442 }
 0x397   :  { %v1538_v23 = vsel %vm1522_vm2, %v1443_v19, 0.0  ;;  %v1540_v7 = vsel %vm1522_vm2, %v1445_v16, 0.0 }
 0x398   :  { %v1539_v9 = vadd.f32 %v1538_v23, %v1537_v6 }
 0x39a   :  { %v1541_v41 = vadd.f32 %v1540_v7, %v1539_v9  ;;  %v1449_v24 = vpop.permute.xlu1 %1448  ;;  %v1455_v62 = vpop.permute.xlu0 %1454 }
 0x39b   :  { %v1544_v34 = vsel %vm1522_vm2, %v1449_v24, 0.0  ;;  %v1550_v10 = vsel %vm1522_vm2, %v1455_v62, 0.0 }
 0x39c   :  { %v1543_v33 = vadd.f32 %v1542_v54, %v1541_v41 }
 0x39e   :  { %v1545_v5 = vadd.f32 %v1544_v34, %v1543_v33  ;;  %v1453_v27 = vpop.permute.xlu1 %1452  ;;  %v1451_v36 = vpop.permute.xlu0 %1450 }
 0x39f   :  { %v1546_v49 = vsel %vm1522_vm2, %v1451_v36, 0.0  ;;  %v1548_v0 = vsel %vm1522_vm2, %v1453_v27, 0.0 }
 0x3a0   :  { %v1547_v12 = vadd.f32 %v1546_v49, %v1545_v5 }
 0x3a2   :  { %v1549_v20 = vadd.f32 %v1548_v0, %v1547_v12  ;;  %v1457_v31 = vpop.permute.xlu1 %1456  ;;  %v1459_v17 = vpop.permute.xlu0 %1458 }
 0x3a3   :  { %v1552_v50 = vsel %vm1522_vm2, %v1457_v31, 0.0  ;;  %v1554_v38 = vsel %vm1522_vm2, %v1459_v17, 0.0 }
 0x3a4   :  { %v1551_v39 = vadd.f32 %v1550_v10, %v1549_v20 }
 0x3a6   :  { %v1553_v30 = vadd.f32 %v1552_v50, %v1551_v39  ;;  %v1461_v51 = vpop.permute.xlu1 %1460  ;;  %v1463_v35 = vpop.permute.xlu0 %1462 }
 0x3a7   :  { %v1556_v52 = vsel %vm1522_vm2, %v1461_v51, 0.0  ;;  %v1558_v29 = vsel %vm1522_vm2, %v1463_v35, 0.0 }
 0x3a8   :  { %v1555_v37 = vadd.f32 %v1554_v38, %v1553_v30 }
 0x3aa   :  { %v1557_v32 = vadd.f32 %v1556_v52, %v1555_v37  ;;  %v1465_v21 = vpop.permute.xlu1 %1464  ;;  %v1467_v11 = vpop.permute.xlu0 %1466 }
 0x3ab   :  { %v1560_v46 = vsel %vm1522_vm2, %v1465_v21, 0.0  ;;  %v1562_v13 = vsel %vm1522_vm2, %v1467_v11, 0.0 }
 0x3ac   :  { %v1559_v40 = vadd.f32 %v1558_v29, %v1557_v32 }
 0x3ae   :  { %v1561_v59 = vadd.f32 %v1560_v46, %v1559_v40  ;;  %v1469_v57 = vpop.permute.xlu1 %1468  ;;  %v1471_v26 = vpop.permute.xlu0 %1470 }
 0x3af   :  { %v1564_v18 = vsel %vm1522_vm2, %v1469_v57, 0.0  ;;  %v1566_v1 = vsel %vm1522_vm2, %v1471_v26, 0.0 }
 0x3b0   :  { %v1563_v2 = vadd.f32 %v1562_v13, %v1561_v59 }
 0x3b2   :  { %v1565_v43 = vadd.f32 %v1564_v18, %v1563_v2  ;;  %v1473_v55 = vpop.permute.xlu1 %1472  ;;  %v1475_v48 = vpop.permute.xlu0 %1474 }
 0x3b3   :  { %v1568_v42 = vsel %vm1522_vm2, %v1473_v55, 0.0  ;;  %v1570_v22 = vsel %vm1522_vm2, %v1475_v48, 0.0 }
 0x3b4   :  { %v1567_v15 = vadd.f32 %v1566_v1, %v1565_v43 }
 0x3b6   :  { %v1569_v28 = vadd.f32 %v1568_v42, %v1567_v15  ;;  %v1833_v45 = vpop.permute.xlu1 %1832  ;;  %v1838_v4 = vpop.permute.xlu0 %1837 }
 0x3b7   :  { %v1835_v3 = vunpack.i.h.bf16 %v1833_v45  ;;  %v1834_v53 = vunpack.i.l.bf16 %v1833_v45  ;;  %v1839_v58 = vunpack.i.l.bf16 %v1838_v4  ;;  %v1840_v6 = vunpack.i.h.bf16 %v1838_v4 }
 0x3b8   :  { %v1571_v8 = vadd.f32 %v1570_v22, %v1569_v28 }
 0x3b9   :  { %v1572_v63 = vsel %vm1522_vm2, %v1834_v53, 0.0  ;;  %v1574_v23 = vsel %vm1522_vm2, %v1835_v3, 0.0  ;;  %v1576_v9 = vsel %vm1522_vm2, %v1839_v58, 0.0  ;;  %v1578_v24 = vsel %vm1522_vm2, %v1840_v6, 0.0 }
 0x3ba   :  { %v1573_v16 = vadd.f32 %v1572_v63, %v1571_v8  ;;  %v1843_v19 = vpop.permute.xlu1 %1842  ;;  %v1489_v5 = vpop.permute.xlu0 %1488 }
 0x3bb   :  { %v1844_v41 = vunpack.i.l.bf16 %v1843_v19  ;;  %v1845_v54 = vunpack.i.h.bf16 %v1843_v19  ;;  %v1584_v12 = vsel %vm1522_vm2, %v1489_v5, 0.0 }
 0x3bc   :  { %v1575_v7 = vadd.f32 %v1574_v23, %v1573_v16 }
 0x3bd   :  { %v1580_v34 = vsel %vm1522_vm2, %v1844_v41, 0.0  ;;  %v1582_v36 = vsel %vm1522_vm2, %v1845_v54, 0.0 }
 0x3be   :  { %v1577_v62 = vadd.f32 %v1576_v9, %v1575_v7 }
 0x3c0   :  { %v1579_v33 = vadd.f32 %v1578_v24, %v1577_v62 }
 0x3c2   :  { %v1581_v27 = vadd.f32 %v1580_v34, %v1579_v33 }
 0x3c4   :  { %v1583_v49 = vadd.f32 %v1582_v36, %v1581_v27 }
 0x3c6   :  { %v1585_v0 = vadd.f32 %v1584_v12, %v1583_v49 }
 0x3c8   :  { %1586 = vadd.xlane.f32.xlu0 %v1585_v0 }
 0x3f4   :  { %v383_v20 = vpop.xlane.xlu0 %382 }
 0x3f5   :  { %v425_v31 = vsub.f32 %v3095_v44, %v383_v20 }
 0x3f7   :  { %v483_v17 = vmul.f32 1.442695, %v425_v31 }
 0x3f8   :  { %v386_v10 = vpop.xlane.xlu0 %385 }
 0x3f9   :  { %1998 = vpow2.f32 %v483_v17  ;;  %v426_v39 = vsub.f32 %v3098_v61, %v386_v10  ;;  %v380_v50 = vpop.xlane.xlu1 %379 }
 0x3fa   :  { %v424_v30 = vsub.f32 %v3103_v47, %v380_v50 }
 0x3fb   :  { %v485_v51 = vmul.f32 1.442695, %v426_v39 }
 0x3fc   :  { %v481_v35 = vmul.f32 1.442695, %v424_v30  ;;  %v389_v38 = vpop.xlane.xlu0 %388 }
 0x3fd   :  { %v427_v37 = vsub.f32 %v3106_v56, %v389_v38  ;;  %v392_v52 = vpop.xlane.xlu1 %391 }
 0x3fe   :  { %2000 = vpow2.f32 %v481_v35  ;;  %v428_v32 = vsub.f32 %v3109_v14, %v392_v52 }
 0x3ff   :  { %v487_v21 = vmul.f32 1.442695, %v427_v37  ;;  %2002 = vpow2.f32 %v485_v51 }
 0x400   :  { %v489_v44 = vmul.f32 1.442695, %v428_v32  ;;  %v395_v11 = vpop.xlane.xlu0 %394 }
 0x401   :  { %2004 = vpow2.f32 %v487_v21  ;;  %v429_v29 = vsub.f32 %v3120_v25, %v395_v11  ;;  %v398_v61 = vpop.xlane.xlu1 %397 }
 0x402   :  { %v430_v40 = vsub.f32 %v3123_v60, %v398_v61  ;;  %2006 = vpow2.f32 %v489_v44 }
 0x403   :  { %v1999_v47 = vpop.eup %1998  ;;  %v491_v46 = vmul.f32 1.442695, %v429_v29 }
 0x404   :  { %v493_v59 = vmul.f32 1.442695, %v430_v40  ;;  %v573_v56 = vsel %vm302_vm1, %v1999_v47, 0.0 }
 0x405   :  { %2008 = vpow2.f32 %v491_v46  ;;  %574 = vadd.xlane.f32.xlu0 %v573_v56 }
 0x406   :  { %2010 = vpow2.f32 %v493_v59 }
 0x408   :  { %v2001_v57 = vpop.eup %2000 }
 0x409   :  { %v570_v14 = vsel %vm302_vm1, %v2001_v57, 0.0  ;;  %v2003_v26 = vpop.eup %2002 }
 0x40a   :  { %571 = vadd.xlane.f32.xlu1 %v570_v14  ;;  %v576_v60 = vsel %vm302_vm1, %v2003_v26, 0.0 }
 0x40b   :  { %v2005_v13 = vpop.eup %2004 }
 0x40c   :  { %v579_v25 = vsel %vm302_vm1, %v2005_v13, 0.0  ;;  %v2007_v2 = vpop.eup %2006 }
 0x40d   :  { %580 = vadd.xlane.f32.xlu0 %v579_v25  ;;  %v582_v55 = vsel %vm302_vm1, %v2007_v2, 0.0 }
 0x40e   :  { %577 = vadd.xlane.f32.xlu1 %v576_v60 }
 0x40f   :  { %v2009_v18 = vpop.eup %2008 }
 0x410   :  { %v585_v43 = vsel %vm302_vm1, %v2009_v18, 0.0  ;;  %v2011_v48 = vpop.eup %2010 }
 0x411   :  { %586 = vadd.xlane.f32.xlu0 %v585_v43  ;;  %v588_v1 = vsel %vm302_vm1, %v2011_v48, 0.0 }
 0x412   :  { %583 = vadd.xlane.f32.xlu1 %v582_v55 }
 0x416   :  { %589 = vadd.xlane.f32.xlu1 %v588_v1 }
 0x455   :  { %v1587_v15 = vpop.xlane.xlu0 %1586 }
 0x456   :  { %v1588_v42 = vrot.slane %v1587_v15, 4 }
 0x458   :  { %v1589_v28 = vadd.f32 %v1588_v42, %v1587_v15 }
 0x45a   :  { %v1590_v45 = vrot.slane %v1589_v28, 2 }
 0x45c   :  { %v1591_v4 = vadd.f32 %v1590_v45, %v1589_v28 }
 0x45e   :  { %v1592_v22 = vrot.slane %v1591_v4, 1 }
 0x460   :  { %v1593_v3 = vadd.f32 %v1592_v22, %v1591_v4 }
 0x462   :  { %1825 = vpush %v1593_v3 }
 0x492   :  { %v575_v53 = vpop.xlane.xlu0 %574 }
 0x493   :  { %2012 = vrcp.f32 %v575_v53  ;;  %s1826_s6 = spop %1825 }
 0x494   :  { %v1595_v58 = vstv %s1826_s6 }
 0x495   :  { %1597 = vst.msk [vmem:[#allocation3] sm:$0x1] %vm1596_vm3, %v1595_v58 }
 0x496   :  { %2038 = shalt.err (!%p2035_p4)
}
 0x497   :  { %s2039_s11 = scalar_lea.hbm %s3192_s5, 16 }
 0x498   :  { %p2040_p5 = scmp.ne.s32.totalorder %s3192_s5, %s2039_s11  ;;  %p2043_p6 = scmp.lt.u32.totalorder %s2039_s11, %s3192_s5 }
 0x49a   :  { %p2045_p7 = pnand %p2043_p6, %p2040_p5 }
 0x49c   :  { %2048 = shalt.err (!%p2045_p7)
}
 0x49d   :  { %1737 = dma.vmem_to_hbm [thread:$0]  %s1735_s0, 16, %s3192_s5, [#allocation4]   ;;  %v572_v8 = vpop.xlane.xlu1 %571  ;;  %v581_v63 = vpop.xlane.xlu0 %580 }
 0x49e   :  { %2014 = vrcp.f32 %v572_v8  ;;  %v2013_v16 = vpop.eup %2012 }
 0x49f   :  { %2016 = vrcp.f32 %v581_v63 }
 0x4a1   :  { %v578_v6 = vpop.xlane.xlu1 %577  ;;  %v587_v19 = vpop.xlane.xlu0 %586 }
 0x4a2   :  { %2018 = vrcp.f32 %v578_v6 }
 0x4a3   :  { %2020 = vrcp.f32 %v587_v19 }
 0x4a5   :  { %v584_v23 = vpop.xlane.xlu1 %583 }
 0x4a6   :  { %2022 = vrcp.f32 %v584_v23 }
 0x4a8   :  { %v2015_v9 = vpop.eup %2014 }
 0x4a9   :  { %v590_v7 = vpop.xlane.xlu1 %589  ;;  %v2017_v41 = vpop.eup %2016 }
 0x4aa   :  { %2024 = vrcp.f32 %v590_v7 }
 0x4ac   :  { %v2019_v24 = vpop.eup %2018 }
 0x4ad   :  { %v2021_v62 = vpop.eup %2020 }
 0x4b0   :  { %v2023_v54 = vpop.eup %2022 }
 0x4b4   :  { %v2025_v33 = vpop.eup %2024 }
 0x4b5   :  { %2049 = dma.done.wait [#allocation4], 16  }
 0x4b6   :  { %2050 = vsyncadd [#allocation4], 4294967280 }
 0x4b7   :  { %1743 = vsyncpa [#allocation4], 1 }

</bundles_post_ra>
